<compile_context>
chip_gen: v7x
topology: tpu7x:2x2x1
jax: 0.10.0
libtpu: 0.0.40
codegen_flags: <defaults>
</compile_context>

<pallas_src>
import functools
import math

import numpy as np

import jax
import jax.numpy as jnp
from jax.experimental import pallas as pl
from jax.experimental.pallas import tpu as pltpu


# ---------------------------------------------------------------------------
# Elementwise helpers built from Pallas-TPU-safe ops.
# ---------------------------------------------------------------------------
# Abramowitz & Stegun 4.4.47 (5 coeffs), |err| <= 1e-5 on [0, 1].
_ATAN_COEFFS = (0.0208351, -0.0851330, 0.1801410, -0.3302995, 0.9998660)


def _atan2(y, x):
    ax = jnp.abs(x)
    ay = jnp.abs(y)
    mx = jnp.maximum(ax, ay)
    mn = jnp.minimum(ax, ay)
    denom = jnp.where(mx == 0.0, jnp.float32(1.0), mx)
    # divide moved off the VALU onto the (idle) EUP slot
    a = mn * pl.reciprocal(denom, approx=True)            # in [0, 1]
    s = a * a
    p = jnp.float32(_ATAN_COEFFS[0])
    for c in _ATAN_COEFFS[1:]:
        p = p * s + jnp.float32(c)
    r = p * a                                              # atan(a)
    r = jnp.where(ay > ax, jnp.float32(math.pi / 2) - r, r)
    r = jnp.where(x < 0.0, jnp.float32(math.pi) - r, r)
    r = jnp.where(y < 0.0, -r, r)
    return r


# Even Taylor polynomial of cos up to x^14; |err| <= ~5e-6 on [-pi, pi].
_COS_COEFFS = (-1.0 / 87178291200.0, 1.0 / 479001600.0, -1.0 / 3628800.0,
               1.0 / 40320.0, -1.0 / 720.0, 1.0 / 24.0, -0.5, 1.0)


def _cos_bounded(x):
    """cos(x) for |x| <= pi (argument here is lfs*atan2, lfs in (0,1)).

    Skips jnp.cos's generic range reduction: plain FMAs on the VALU, which is
    the binding slot in the small/medium n_fft regime."""
    s = x * x
    p = jnp.float32(_COS_COEFFS[0])
    for c in _COS_COEFFS[1:]:
        p = p * s + jnp.float32(c)
    return p


# ---------------------------------------------------------------------------
# Pallas kernel: fused windowed-DFT matmul + magnitude/phase + accumulation.
# Grid: (batch * split, time_tiles).  Per-(batch,split-part) partial sums are
# accumulated in VMEM scratch across the time axis, reduced and written out at
# the last time step.
# ---------------------------------------------------------------------------
def _lf4smp_kernel(f_ref, cs_ref, lfs_ref, out_ref,
                   acc_d2, acc_u2, acc_la, acc_cd, *, f_pad, t_tile, eps):
    t = pl.program_id(1)

    @pl.when(t == 0)
    def _init():
        acc_d2[...] = jnp.zeros_like(acc_d2)
        acc_u2[...] = jnp.zeros_like(acc_u2)
        acc_la[...] = jnp.zeros_like(acc_la)
        acc_cd[...] = jnp.zeros_like(acc_cd)

    # Block row layout: [true-frames tile (t_tile rows) ; pred-frames tile].
    frames = f_ref[0]                   # (2*t_tile, n_fft)  bf16
    cs = cs_ref[...]                    # (n_fft, 2*f_pad)   bf16, lfs folded
    lfs = lfs_ref[...]                  # (1, f_pad)         f32 (angle scale)

    # Single MXU matmul per step: M = 2*t_tile fills the 256-wide MXU on
    # v6e/v7x and streams the cs RHS once for both inputs.
    z = jnp.dot(frames, cs, preferred_element_type=jnp.float32)

    # 8-aligned row slices / 128-aligned lane slices -> layout-free splits.
    re_t = z[:t_tile, :f_pad]
    im_t = z[:t_tile, f_pad:]
    re_p = z[t_tile:, :f_pad]
    im_p = z[t_tile:, f_pad:]

    # lfs is folded into cs, so magnitudes come out pre-scaled.
    s_t = jnp.sqrt(re_t * re_t + im_t * im_t) + eps
    s_p = jnp.sqrt(re_p * re_p + im_p * im_p) + eps

    # atan2 is scale invariant (lfs > 0), so pre-scaling does not change it.
    ang_t = _atan2(im_t, re_t) * lfs
    ang_p = _atan2(im_p, re_p) * lfs

    d = s_t - s_p
    u = s_t + s_p
    cd = _cos_bounded(ang_t) - _cos_bounded(ang_p)
    la = jnp.abs(jnp.log(s_t) - jnp.log(s_p))

    def _accum(acc_ref, v):
        # Pre-reduce the (t_tile, f_pad) contribution down to one (8, f_pad)
        # sublane group (aligned 8-row slices, pure VALU adds) before touching
        # the accumulator: ~t_tile/8 less accumulator load/store traffic.
        r = v[0:8, :]
        for blk in range(1, t_tile // 8):
            r = r + v[blk * 8:(blk + 1) * 8, :]
        acc_ref[...] += r

    _accum(acc_d2, d * d)
    _accum(acc_u2, u * u)
    _accum(acc_la, la)
    _accum(acc_cd, cd * cd)

    @pl.when(t == pl.num_programs(1) - 1)
    def _finalize():
        lane = jax.lax.broadcasted_iota(jnp.int32, (8, 128), 1)
        vals = (jnp.where(lane == 0, jnp.sum(acc_d2[...]), 0.0)
                + jnp.where(lane == 1, jnp.sum(acc_u2[...]), 0.0)
                + jnp.where(lane == 2, jnp.sum(acc_la[...]), 0.0)
                + jnp.where(lane == 3, jnp.sum(acc_cd[...]), 0.0))
        out_ref[...] = vals[None]       # (1, 8, 128) full unmasked store


# ---------------------------------------------------------------------------
# Plain-numpy constants: window, DFT matrices (lfs-folded, lane-padded).
# ---------------------------------------------------------------------------
def _lf4smp_constants(n_fft, window_kind):
    n = np.arange(n_fft, dtype=np.float64)
    if window_kind == "hann":          # torch.hann_window (periodic=True)
        w = 0.5 - 0.5 * np.cos(2.0 * np.pi * n / n_fft)
    elif window_kind == "blackman":    # torch.blackman_window (periodic=True)
        w = (0.42 - 0.5 * np.cos(2.0 * np.pi * n / n_fft)
             + 0.08 * np.cos(4.0 * np.pi * n / n_fft))
    else:
        raise ValueError(window_kind)
    norm = np.sqrt(np.sum(w * w))      # torchaudio normalized=True ("window")

    n_bins = n_fft // 2 + 1
    f_pad = -(-n_bins // 128) * 128                       # pad F to 128 lanes
    f = np.arange(n_bins)
    k = (np.arange(n_fft)[:, None] * f[None, :]) % n_fft  # exact angle reduce
    ang = (2.0 * np.pi / n_fft) * k

    lfs = np.log2(np.arange(n_bins) + 2.0) / np.log2(float(n_fft))  # (F,)

    c_mat = (w[:, None] * np.cos(ang)) / norm * lfs[None, :]
    s_mat = (-w[:, None] * np.sin(ang)) / norm * lfs[None, :]   # exp(-i ang)

    pad = f_pad - n_bins
    c_mat = np.pad(c_mat, ((0, 0), (0, pad)))
    s_mat = np.pad(s_mat, ((0, 0), (0, pad)))
    cs = jnp.asarray(np.concatenate([c_mat, s_mat], axis=1), dtype=jnp.bfloat16)

    lfs_pad = jnp.asarray(np.pad(lfs, (0, pad))[None, :], dtype=jnp.float32)
    return cs, lfs_pad, n_bins, f_pad


def _frames(x, n_fft):
    """Zero pad (F.pad) + center reflect pad + contiguous framing.

    hop == n_fft, so kept frames [1:-1] are a contiguous slice + reshape
    (no gather).  Returned directly as bf16 so no f32 framed copy is ever
    materialized in HBM."""
    hop = n_fft
    pad_edges = n_fft // 2
    x1 = jnp.pad(x, ((0, 0), (pad_edges, pad_edges)))             # constant 0
    half = n_fft // 2
    x2 = jnp.pad(x1, ((0, 0), (half, half)), mode="reflect")      # center=True
    length = x2.shape[1]
    n_frames = 1 + (length - n_fft) // hop
    n_keep = n_frames - 2                                         # [:, :, 1:-1]
    assert n_keep >= 1, "signal too short for this n_fft"
    b = x.shape[0]
    frames = x2[:, hop: hop + n_keep * n_fft].reshape(b, n_keep, n_fft)
    return frames.astype(jnp.bfloat16)                            # (B, T, N)


# ---------------------------------------------------------------------------
# Device / feature probes and tiling heuristics.
# ---------------------------------------------------------------------------
@functools.lru_cache(maxsize=None)
def _single_buffer_supported():
    """Probe whether pipeline_mode=pl.Buffered(1) (single-buffered constant
    inputs) compiles on the installed Pallas/Mosaic; fall back otherwise."""
    try:
        def k(x_ref, o_ref):
            o_ref[...] = x_ref[...] + 1.0

        fn = pl.pallas_call(
            k,
            out_shape=jax.ShapeDtypeStruct((8, 128), jnp.float32),
            grid=(2,),
            in_specs=[pl.BlockSpec((8, 128), lambda i: (0, 0),
                                   pipeline_mode=pl.Buffered(1))],
            out_specs=pl.BlockSpec((8, 128), lambda i: (0, 0)),
        )
        jax.jit(fn).lower(jnp.zeros((8, 128), jnp.float32)).compile()
        return True
    except Exception:   # noqa: BLE001 — any failure: use double buffering
        return False


@functools.lru_cache(maxsize=None)
def _vmem_limit_bytes():
    """~75% of physical VMEM capped at 100 MiB: 96 MiB on v5e/v6e (128 MiB),
    48 MiB on v7x (64 MiB); 48 MiB fallback if the query is unavailable."""
    try:
        cap = int(pltpu.get_tpu_info().vmem_capacity_bytes)
    except Exception:   # noqa: BLE001
        cap = 64 * 1024 * 1024
    return int(min(cap * 3 // 4, 100 * 1024 * 1024))


def _choose_time_tile(n_fft, f_pad, vmem_limit, cs_buffers):
    """Largest time tile whose rough VMEM footprint fits ~60% of the limit.

    Big tiles amortize the ~0.35us/grid-step overhead and fill the MXU's M
    dimension.  Awkward frame counts are padded up (never many tiny steps);
    padded frames' contribution is corrected exactly in the wrapper."""
    def footprint(tt):
        inp = 2 * (2 * tt) * n_fft * 2              # stacked block, 2 buffers
        cst = cs_buffers * n_fft * (2 * f_pad) * 2  # DFT table
        z = (2 * tt) * (2 * f_pad) * 4              # MXU result
        tmp = 12 * tt * f_pad * 4                   # live elementwise temps
        acc = 4 * 8 * f_pad * 4
        return inp + cst + z + tmp + acc

    tile = 512 if n_fft <= 128 else 256
    while tile > 16 and footprint(tile) > (vmem_limit * 3) // 5:
        tile //= 2
    return tile


# ---------------------------------------------------------------------------
# Wrappers.
# ---------------------------------------------------------------------------
def lf4smp_loss(x_true, x_pred, *, n_fft, window_kind, alpha, beta, eps=1e-7):
    """LF4SMPLoss.forward for one n_fft (`beta` here is the inner beta/gamma)."""
    cs, lfs_pad, n_bins, f_pad = _lf4smp_constants(n_fft, window_kind)
    ft = _frames(x_true, n_fft)                        # (B, T, N) bf16
    fp = _frames(x_pred, n_fft)
    b, t_frames, _ = ft.shape

    # v7x has 2 TensorCores; if batch (the parallel axis) is 1, split the time
    # axis into 2 core-parallel halves and combine the partial sums outside.
    split = 2 if b == 1 else 1

    vmem_limit = _vmem_limit_bytes()
    single_buf = _single_buffer_supported()
    t_tile = _choose_time_tile(n_fft, f_pad, vmem_limit, 1 if single_buf else 2)
    per_split = -(-t_frames // split)
    if per_split < t_tile:                             # whole extent: one tile
        t_tile = max(8, -(-per_split // 8) * 8)
    t_padded = -(-t_frames // (t_tile * split)) * (t_tile * split)
    num_t = t_padded // t_tile
    num_t_split = num_t // split

    if t_padded > t_frames:
        pad = ((0, 0), (0, t_padded - t_frames), (0, 0))
        ft = jnp.pad(ft, pad)
        fp = jnp.pad(fp, pad)

    # Interleave true/pred per time tile: row block j holds [true tile j ;
    # pred tile j] so the kernel runs ONE (2*t_tile, n_fft) x (n_fft, 2*f_pad)
    # matmul per step.  Pure host-side layout plumbing (bf16).
    fs = jnp.stack([ft, fp], axis=1).reshape(b, 2, num_t, t_tile, n_fft)
    f_inter = jnp.transpose(fs, (0, 2, 1, 3, 4)).reshape(
        b, num_t * 2 * t_tile, n_fft)

    if split == 1:
        frame_map = lambda i, j: (i, j, 0)
    else:
        frame_map = lambda i, j: (i // split, (i % split) * num_t_split + j, 0)

    # Grid-constant DFT table / lfs row: single-buffered when supported
    # (halves their VMEM footprint; matters for large n_fft on v7x's 64 MiB).
    const_kwargs = {"pipeline_mode": pl.Buffered(1)} if single_buf else {}
    cs_spec = pl.BlockSpec((n_fft, 2 * f_pad), lambda i, j: (0, 0),
                           **const_kwargs)
    lfs_spec = pl.BlockSpec((1, f_pad), lambda i, j: (0, 0), **const_kwargs)
    # TODO(synk): for n_fft >= 4096 on v7x, add a frequency grid axis that
    # tiles the cs columns instead of holding one monolithic slab in VMEM.

    kernel = functools.partial(_lf4smp_kernel, f_pad=f_pad, t_tile=t_tile,
                               eps=float(eps))

    out = pl.pallas_call(
        kernel,
        out_shape=jax.ShapeDtypeStruct((b * split, 8, 128), jnp.float32),
        grid_spec=pltpu.PrefetchScalarGridSpec(
            num_scalar_prefetch=0,
            grid=(b * split, num_t_split),
            in_specs=[
                pl.BlockSpec((1, 2 * t_tile, n_fft), frame_map),
                cs_spec,
                lfs_spec,
            ],
            out_specs=pl.BlockSpec((1, 8, 128), lambda i, j: (i, 0, 0)),
            scratch_shapes=[pltpu.VMEM((8, f_pad), jnp.float32)] * 4,
        ),
        compiler_params=pltpu.CompilerParams(
            dimension_semantics=("parallel", "arbitrary"),
            vmem_limit_bytes=vmem_limit,
        ),
    )(f_inter, cs, lfs_pad)

    # Combine split-part partials (sums are additive per batch sample).
    terms = jnp.sum(out.reshape(b, split, 8, 128)[:, :, 0, :4], axis=1)  # (B,4)
    sd = terms[:, 0]                                   # sum (S_t - S_p)^2
    # Padded lanes / padded frames each contribute exactly (2*eps)^2 to the
    # (S_t + S_p)^2 accumulator and 0 to the others; subtract that constant.
    n_pad_elems = t_padded * f_pad - t_frames * n_bins
    ss = terms[:, 1] - n_pad_elems * 4.0 * float(eps) ** 2
    la = terms[:, 2]
    ca = terms[:, 3]

    n_elems = b * t_frames * n_bins
    converge_term = jnp.mean(jnp.sqrt(sd) / jnp.sqrt(ss))   # per-sample ratio
    log_term = jnp.sum(la) / n_elems                   # F.l1_loss, mean
    angle_term = jnp.sum(ca) / n_elems                 # mean squared cos diff
    return converge_term + alpha * log_term + beta * angle_term


def dlfssmp_loss(x_pred, x_true, *, fft_min, fft_max,
                 alpha=1.0, beta=0.5, gamma=0.7, eps=1e-7):
    """DLFSSMPLoss.forward.

    torch.randint(0, 1, (2,)) always yields 0, so the (fft-1) branches of the
    PyTorch module are dead code; only fft_min (blackman) and fft_max (hann)
    losses are evaluated.
    """
    loss_min = lf4smp_loss(x_true, x_pred, n_fft=fft_min, window_kind="blackman",
                           alpha=alpha, beta=gamma, eps=eps)
    loss_max = lf4smp_loss(x_true, x_pred, n_fft=fft_max, window_kind="hann",
                           alpha=alpha, beta=gamma, eps=eps)
    return loss_min * (1.0 - beta) + loss_max * beta


if __name__ == "__main__":
    key = jax.random.PRNGKey(0)
    k1, k2 = jax.random.split(key)
    B, T = 2, 64
    fft_min, fft_max = 16, 32

    x_pred = jax.random.normal(k1, (B, T), dtype=jnp.float32)
    x_true = jax.random.normal(k2, (B, T), dtype=jnp.float32)

    loss_fn = jax.jit(functools.partial(dlfssmp_loss, fft_min=fft_min,
                                        fft_max=fft_max))
    loss = loss_fn(x_pred, x_true)
    jax.block_until_ready(loss)
    assert loss.shape == () and bool(jnp.isfinite(loss))
    print("KERNEL_OK")
</pallas_src>

<mosaic_0001>
module attributes {stable_mosaic.version = 11 : i64} {
  func.func @_lf4smp_kernel(%arg0: i32, %arg1: i32, %arg2: memref<1x16x16xbf16, #tpu.memory_space<vmem>>, %arg3: memref<16x256xbf16, #tpu.memory_space<vmem>>, %arg4: memref<1x128xf32, #tpu.memory_space<vmem>>, %arg5: memref<1x8x128xf32, #tpu.memory_space<vmem>>, %arg6: memref<8x128xf32, #tpu.memory_space<vmem>>, %arg7: memref<8x128xf32, #tpu.memory_space<vmem>>, %arg8: memref<8x128xf32, #tpu.memory_space<vmem>>, %arg9: memref<8x128xf32, #tpu.memory_space<vmem>>) attributes {dimension_semantics = [#tpu.dimension_semantics<parallel>, #tpu.dimension_semantics<arbitrary>], iteration_bounds = array<i64: 2, 1>, scalar_prefetch = 0 : i64, scratch_operands = 4 : i64, tpu.core_type = #tpu.core_type<tc>, window_params = [{transform_indices = @transform_0, window_bounds = array<i64: 1, 16, 16>}, {pipeline_mode = #tpu.pipeline_mode<synchronous>, transform_indices = @transform_1, window_bounds = array<i64: 16, 256>}, {pipeline_mode = #tpu.pipeline_mode<synchronous>, transform_indices = @transform_2, window_bounds = array<i64: 1, 128>}, {transform_indices = @transform_3, window_bounds = array<i64: 1, 8, 128>}]} {
    %c0_i32 = arith.constant 0 : i32
    %0 = arith.cmpi eq, %arg1, %c0_i32 : i32
    %1 = arith.extui %0 : i1 to i32
    %c0_i32_0 = arith.constant 0 : i32
    %2 = arith.cmpi ne, %1, %c0_i32_0 : i32
    scf.if %2 {
      %cst_67 = arith.constant 0.000000e+00 : f32
      %177 = vector.broadcast %cst_67 : f32 to vector<8x128xf32>
      %c0_68 = arith.constant 0 : index
      %c0_69 = arith.constant 0 : index
      %178 = vector.load %arg6[%c0_68, %c0_69] : memref<8x128xf32, #tpu.memory_space<vmem>>, vector<8x128xf32>
      tpu.vector_store %arg6[%c0_68, %c0_69], %177 {strides = array<i32>} : memref<8x128xf32, #tpu.memory_space<vmem>>, vector<8x128xf32>,
      %cst_70 = arith.constant 0.000000e+00 : f32
      %179 = vector.broadcast %cst_70 : f32 to vector<8x128xf32>
      %c0_71 = arith.constant 0 : index
      %c0_72 = arith.constant 0 : index
      %180 = vector.load %arg7[%c0_71, %c0_72] : memref<8x128xf32, #tpu.memory_space<vmem>>, vector<8x128xf32>
      tpu.vector_store %arg7[%c0_71, %c0_72], %179 {strides = array<i32>} : memref<8x128xf32, #tpu.memory_space<vmem>>, vector<8x128xf32>,
      %cst_73 = arith.constant 0.000000e+00 : f32
      %181 = vector.broadcast %cst_73 : f32 to vector<8x128xf32>
      %c0_74 = arith.constant 0 : index
      %c0_75 = arith.constant 0 : index
      %182 = vector.load %arg8[%c0_74, %c0_75] : memref<8x128xf32, #tpu.memory_space<vmem>>, vector<8x128xf32>
      tpu.vector_store %arg8[%c0_74, %c0_75], %181 {strides = array<i32>} : memref<8x128xf32, #tpu.memory_space<vmem>>, vector<8x128xf32>,
      %cst_76 = arith.constant 0.000000e+00 : f32
      %183 = vector.broadcast %cst_76 : f32 to vector<8x128xf32>
      %c0_77 = arith.constant 0 : index
      %c0_78 = arith.constant 0 : index
      %184 = vector.load %arg9[%c0_77, %c0_78] : memref<8x128xf32, #tpu.memory_space<vmem>>, vector<8x128xf32>
      tpu.vector_store %arg9[%c0_77, %c0_78], %183 {strides = array<i32>} : memref<8x128xf32, #tpu.memory_space<vmem>>, vector<8x128xf32>,
    } else {
    }
    %c0 = arith.constant 0 : index
    %c0_1 = arith.constant 0 : index
    %c0_2 = arith.constant 0 : index
    %3 = vector.load %arg2[%c0, %c0_1, %c0_2] : memref<1x16x16xbf16, #tpu.memory_space<vmem>>, vector<1x16x16xbf16>
    %4 = vector.shape_cast %3 : vector<1x16x16xbf16> to vector<16x16xbf16>
    %c0_3 = arith.constant 0 : index
    %c0_4 = arith.constant 0 : index
    %5 = vector.load %arg3[%c0_3, %c0_4] : memref<16x256xbf16, #tpu.memory_space<vmem>>, vector<16x256xbf16>
    %c0_5 = arith.constant 0 : index
    %c0_6 = arith.constant 0 : index
    %6 = vector.load %arg4[%c0_5, %c0_6] : memref<1x128xf32, #tpu.memory_space<vmem>>, vector<1x128xf32>
    %cst = arith.constant dense<0.000000e+00> : vector<16x256xf32>
    %7 = tpu.matmul %4, %5, %cst {dimension_numbers = #tpu.dot_dimension_numbers<[1], [0], [0], [1], [0, 0, 1, 1], [], []>} : vector<16x16xbf16>, vector<16x256xbf16>, vector<16x256xf32> -> vector<16x256xf32>
    %8 = vector.extract_strided_slice %7 {offsets = [0, 0], sizes = [8, 128], strides = [1, 1]} : vector<16x256xf32> to vector<8x128xf32>
    %9 = vector.extract_strided_slice %7 {offsets = [0, 128], sizes = [8, 128], strides = [1, 1]} : vector<16x256xf32> to vector<8x128xf32>
    %10 = vector.extract_strided_slice %7 {offsets = [8, 0], sizes = [8, 128], strides = [1, 1]} : vector<16x256xf32> to vector<8x128xf32>
    %11 = vector.extract_strided_slice %7 {offsets = [8, 128], sizes = [8, 128], strides = [1, 1]} : vector<16x256xf32> to vector<8x128xf32>
    %12 = arith.mulf %8, %8 : vector<8x128xf32>
    %13 = arith.mulf %9, %9 : vector<8x128xf32>
    %14 = arith.addf %12, %13 : vector<8x128xf32>
    %15 = math.sqrt %14 : vector<8x128xf32>
    %cst_7 = arith.constant 1.000000e-07 : f32
    %16 = vector.broadcast %cst_7 : f32 to vector<8x128xf32>
    %17 = arith.addf %15, %16 : vector<8x128xf32>
    %18 = arith.mulf %10, %10 : vector<8x128xf32>
    %19 = arith.mulf %11, %11 : vector<8x128xf32>
    %20 = arith.addf %18, %19 : vector<8x128xf32>
    %21 = math.sqrt %20 : vector<8x128xf32>
    %cst_8 = arith.constant 1.000000e-07 : f32
    %22 = vector.broadcast %cst_8 : f32 to vector<8x128xf32>
    %23 = arith.addf %21, %22 : vector<8x128xf32>
    %24 = math.absf %8 : vector<8x128xf32>
    %25 = math.absf %9 : vector<8x128xf32>
    %26 = arith.maximumf %24, %25 : vector<8x128xf32>
    %27 = arith.minimumf %24, %25 : vector<8x128xf32>
    %cst_9 = arith.constant 0.000000e+00 : f32
    %28 = vector.broadcast %cst_9 : f32 to vector<8x128xf32>
    %29 = arith.cmpf oeq, %26, %28 : vector<8x128xf32>
    %cst_10 = arith.constant 1.000000e+00 : f32
    %30 = vector.broadcast %cst_10 : f32 to vector<8x128xf32>
    %31 = arith.select %29, %30, %26 : vector<8x128xi1>, vector<8x128xf32>
    %32 = tpu.reciprocal %31 {approx = true} : vector<8x128xf32> -> vector<8x128xf32>
    %33 = arith.mulf %27, %32 : vector<8x128xf32>
    %34 = arith.mulf %33, %33 : vector<8x128xf32>
    %cst_11 = arith.constant 2.083510e-02 : f32
    %35 = vector.broadcast %cst_11 : f32 to vector<8x128xf32>
    %36 = arith.mulf %35, %34 : vector<8x128xf32>
    %cst_12 = arith.constant -8.513300e-02 : f32
    %37 = vector.broadcast %cst_12 : f32 to vector<8x128xf32>
    %38 = arith.addf %36, %37 : vector<8x128xf32>
    %39 = arith.mulf %38, %34 : vector<8x128xf32>
    %cst_13 = arith.constant 1.801410e-01 : f32
    %40 = vector.broadcast %cst_13 : f32 to vector<8x128xf32>
    %41 = arith.addf %39, %40 : vector<8x128xf32>
    %42 = arith.mulf %41, %34 : vector<8x128xf32>
    %cst_14 = arith.constant -0.330299497 : f32
    %43 = vector.broadcast %cst_14 : f32 to vector<8x128xf32>
    %44 = arith.addf %42, %43 : vector<8x128xf32>
    %45 = arith.mulf %44, %34 : vector<8x128xf32>
    %cst_15 = arith.constant 9.998660e-01 : f32
    %46 = vector.broadcast %cst_15 : f32 to vector<8x128xf32>
    %47 = arith.addf %45, %46 : vector<8x128xf32>
    %48 = arith.mulf %47, %33 : vector<8x128xf32>
    %49 = arith.cmpf ogt, %25, %24 : vector<8x128xf32>
    %cst_16 = arith.constant 1.57079637 : f32
    %50 = vector.broadcast %cst_16 : f32 to vector<8x128xf32>
    %51 = arith.subf %50, %48 : vector<8x128xf32>
    %52 = arith.select %49, %51, %48 : vector<8x128xi1>, vector<8x128xf32>
    %cst_17 = arith.constant 0.000000e+00 : f32
    %53 = vector.broadcast %cst_17 : f32 to vector<8x128xf32>
    %54 = arith.cmpf olt, %8, %53 : vector<8x128xf32>
    %cst_18 = arith.constant 3.14159274 : f32
    %55 = vector.broadcast %cst_18 : f32 to vector<8x128xf32>
    %56 = arith.subf %55, %52 : vector<8x128xf32>
    %57 = arith.select %54, %56, %52 : vector<8x128xi1>, vector<8x128xf32>
    %cst_19 = arith.constant 0.000000e+00 : f32
    %58 = vector.broadcast %cst_19 : f32 to vector<8x128xf32>
    %59 = arith.cmpf olt, %9, %58 : vector<8x128xf32>
    %cst_20 = arith.constant 0.000000e+00 : f32
    %60 = vector.broadcast %cst_20 : f32 to vector<8x128xf32>
    %61 = arith.subf %60, %57 : vector<8x128xf32>
    %62 = arith.select %59, %61, %57 : vector<8x128xi1>, vector<8x128xf32>
    %63 = vector.broadcast %6 : vector<1x128xf32> to vector<8x128xf32>
    %64 = arith.mulf %62, %63 : vector<8x128xf32>
    %65 = math.absf %10 : vector<8x128xf32>
    %66 = math.absf %11 : vector<8x128xf32>
    %67 = arith.maximumf %65, %66 : vector<8x128xf32>
    %68 = arith.minimumf %65, %66 : vector<8x128xf32>
    %cst_21 = arith.constant 0.000000e+00 : f32
    %69 = vector.broadcast %cst_21 : f32 to vector<8x128xf32>
    %70 = arith.cmpf oeq, %67, %69 : vector<8x128xf32>
    %cst_22 = arith.constant 1.000000e+00 : f32
    %71 = vector.broadcast %cst_22 : f32 to vector<8x128xf32>
    %72 = arith.select %70, %71, %67 : vector<8x128xi1>, vector<8x128xf32>
    %73 = tpu.reciprocal %72 {approx = true} : vector<8x128xf32> -> vector<8x128xf32>
    %74 = arith.mulf %68, %73 : vector<8x128xf32>
    %75 = arith.mulf %74, %74 : vector<8x128xf32>
    %cst_23 = arith.constant 2.083510e-02 : f32
    %76 = vector.broadcast %cst_23 : f32 to vector<8x128xf32>
    %77 = arith.mulf %76, %75 : vector<8x128xf32>
    %cst_24 = arith.constant -8.513300e-02 : f32
    %78 = vector.broadcast %cst_24 : f32 to vector<8x128xf32>
    %79 = arith.addf %77, %78 : vector<8x128xf32>
    %80 = arith.mulf %79, %75 : vector<8x128xf32>
    %cst_25 = arith.constant 1.801410e-01 : f32
    %81 = vector.broadcast %cst_25 : f32 to vector<8x128xf32>
    %82 = arith.addf %80, %81 : vector<8x128xf32>
    %83 = arith.mulf %82, %75 : vector<8x128xf32>
    %cst_26 = arith.constant -0.330299497 : f32
    %84 = vector.broadcast %cst_26 : f32 to vector<8x128xf32>
    %85 = arith.addf %83, %84 : vector<8x128xf32>
    %86 = arith.mulf %85, %75 : vector<8x128xf32>
    %cst_27 = arith.constant 9.998660e-01 : f32
    %87 = vector.broadcast %cst_27 : f32 to vector<8x128xf32>
    %88 = arith.addf %86, %87 : vector<8x128xf32>
    %89 = arith.mulf %88, %74 : vector<8x128xf32>
    %90 = arith.cmpf ogt, %66, %65 : vector<8x128xf32>
    %cst_28 = arith.constant 1.57079637 : f32
    %91 = vector.broadcast %cst_28 : f32 to vector<8x128xf32>
    %92 = arith.subf %91, %89 : vector<8x128xf32>
    %93 = arith.select %90, %92, %89 : vector<8x128xi1>, vector<8x128xf32>
    %cst_29 = arith.constant 0.000000e+00 : f32
    %94 = vector.broadcast %cst_29 : f32 to vector<8x128xf32>
    %95 = arith.cmpf olt, %10, %94 : vector<8x128xf32>
    %cst_30 = arith.constant 3.14159274 : f32
    %96 = vector.broadcast %cst_30 : f32 to vector<8x128xf32>
    %97 = arith.subf %96, %93 : vector<8x128xf32>
    %98 = arith.select %95, %97, %93 : vector<8x128xi1>, vector<8x128xf32>
    %cst_31 = arith.constant 0.000000e+00 : f32
    %99 = vector.broadcast %cst_31 : f32 to vector<8x128xf32>
    %100 = arith.cmpf olt, %11, %99 : vector<8x128xf32>
    %cst_32 = arith.constant 0.000000e+00 : f32
    %101 = vector.broadcast %cst_32 : f32 to vector<8x128xf32>
    %102 = arith.subf %101, %98 : vector<8x128xf32>
    %103 = arith.select %100, %102, %98 : vector<8x128xi1>, vector<8x128xf32>
    %104 = vector.broadcast %6 : vector<1x128xf32> to vector<8x128xf32>
    %105 = arith.mulf %103, %104 : vector<8x128xf32>
    %106 = arith.subf %17, %23 : vector<8x128xf32>
    %107 = arith.addf %17, %23 : vector<8x128xf32>
    %108 = arith.mulf %64, %64 : vector<8x128xf32>
    %cst_33 = arith.constant -1.14707454E-11 : f32
    %109 = vector.broadcast %cst_33 : f32 to vector<8x128xf32>
    %110 = arith.mulf %109, %108 : vector<8x128xf32>
    %cst_34 = arith.constant 2.08767559E-9 : f32
    %111 = vector.broadcast %cst_34 : f32 to vector<8x128xf32>
    %112 = arith.addf %110, %111 : vector<8x128xf32>
    %113 = arith.mulf %112, %108 : vector<8x128xf32>
    %cst_35 = arith.constant -2.755732E-7 : f32
    %114 = vector.broadcast %cst_35 : f32 to vector<8x128xf32>
    %115 = arith.addf %113, %114 : vector<8x128xf32>
    %116 = arith.mulf %115, %108 : vector<8x128xf32>
    %cst_36 = arith.constant 2.48015876E-5 : f32
    %117 = vector.broadcast %cst_36 : f32 to vector<8x128xf32>
    %118 = arith.addf %116, %117 : vector<8x128xf32>
    %119 = arith.mulf %118, %108 : vector<8x128xf32>
    %cst_37 = arith.constant -0.00138888892 : f32
    %120 = vector.broadcast %cst_37 : f32 to vector<8x128xf32>
    %121 = arith.addf %119, %120 : vector<8x128xf32>
    %122 = arith.mulf %121, %108 : vector<8x128xf32>
    %cst_38 = arith.constant 0.0416666679 : f32
    %123 = vector.broadcast %cst_38 : f32 to vector<8x128xf32>
    %124 = arith.addf %122, %123 : vector<8x128xf32>
    %125 = arith.mulf %124, %108 : vector<8x128xf32>
    %cst_39 = arith.constant -5.000000e-01 : f32
    %126 = vector.broadcast %cst_39 : f32 to vector<8x128xf32>
    %127 = arith.addf %125, %126 : vector<8x128xf32>
    %128 = arith.mulf %127, %108 : vector<8x128xf32>
    %cst_40 = arith.constant 1.000000e+00 : f32
    %129 = vector.broadcast %cst_40 : f32 to vector<8x128xf32>
    %130 = arith.addf %128, %129 : vector<8x128xf32>
    %131 = arith.mulf %105, %105 : vector<8x128xf32>
    %cst_41 = arith.constant -1.14707454E-11 : f32
    %132 = vector.broadcast %cst_41 : f32 to vector<8x128xf32>
    %133 = arith.mulf %132, %131 : vector<8x128xf32>
    %cst_42 = arith.constant 2.08767559E-9 : f32
    %134 = vector.broadcast %cst_42 : f32 to vector<8x128xf32>
    %135 = arith.addf %133, %134 : vector<8x128xf32>
    %136 = arith.mulf %135, %131 : vector<8x128xf32>
    %cst_43 = arith.constant -2.755732E-7 : f32
    %137 = vector.broadcast %cst_43 : f32 to vector<8x128xf32>
    %138 = arith.addf %136, %137 : vector<8x128xf32>
    %139 = arith.mulf %138, %131 : vector<8x128xf32>
    %cst_44 = arith.constant 2.48015876E-5 : f32
    %140 = vector.broadcast %cst_44 : f32 to vector<8x128xf32>
    %141 = arith.addf %139, %140 : vector<8x128xf32>
    %142 = arith.mulf %141, %131 : vector<8x128xf32>
    %cst_45 = arith.constant -0.00138888892 : f32
    %143 = vector.broadcast %cst_45 : f32 to vector<8x128xf32>
    %144 = arith.addf %142, %143 : vector<8x128xf32>
    %145 = arith.mulf %144, %131 : vector<8x128xf32>
    %cst_46 = arith.constant 0.0416666679 : f32
    %146 = vector.broadcast %cst_46 : f32 to vector<8x128xf32>
    %147 = arith.addf %145, %146 : vector<8x128xf32>
    %148 = arith.mulf %147, %131 : vector<8x128xf32>
    %cst_47 = arith.constant -5.000000e-01 : f32
    %149 = vector.broadcast %cst_47 : f32 to vector<8x128xf32>
    %150 = arith.addf %148, %149 : vector<8x128xf32>
    %151 = arith.mulf %150, %131 : vector<8x128xf32>
    %cst_48 = arith.constant 1.000000e+00 : f32
    %152 = vector.broadcast %cst_48 : f32 to vector<8x128xf32>
    %153 = arith.addf %151, %152 : vector<8x128xf32>
    %154 = arith.subf %130, %153 : vector<8x128xf32>
    %155 = math.log %17 : vector<8x128xf32>
    %156 = math.log %23 : vector<8x128xf32>
    %157 = arith.subf %155, %156 : vector<8x128xf32>
    %158 = math.absf %157 : vector<8x128xf32>
    %159 = arith.mulf %106, %106 : vector<8x128xf32>
    %c0_49 = arith.constant 0 : index
    %c0_50 = arith.constant 0 : index
    %160 = vector.load %arg6[%c0_49, %c0_50] : memref<8x128xf32, #tpu.memory_space<vmem>>, vector<8x128xf32>
    %161 = arith.addf %160, %159 : vector<8x128xf32>
    %c0_51 = arith.constant 0 : index
    %c0_52 = arith.constant 0 : index
    %162 = vector.load %arg6[%c0_51, %c0_52] : memref<8x128xf32, #tpu.memory_space<vmem>>, vector<8x128xf32>
    tpu.vector_store %arg6[%c0_51, %c0_52], %161 {strides = array<i32>} : memref<8x128xf32, #tpu.memory_space<vmem>>, vector<8x128xf32>,
    %163 = arith.mulf %107, %107 : vector<8x128xf32>
    %c0_53 = arith.constant 0 : index
    %c0_54 = arith.constant 0 : index
    %164 = vector.load %arg7[%c0_53, %c0_54] : memref<8x128xf32, #tpu.memory_space<vmem>>, vector<8x128xf32>
    %165 = arith.addf %164, %163 : vector<8x128xf32>
    %c0_55 = arith.constant 0 : index
    %c0_56 = arith.constant 0 : index
    %166 = vector.load %arg7[%c0_55, %c0_56] : memref<8x128xf32, #tpu.memory_space<vmem>>, vector<8x128xf32>
    tpu.vector_store %arg7[%c0_55, %c0_56], %165 {strides = array<i32>} : memref<8x128xf32, #tpu.memory_space<vmem>>, vector<8x128xf32>,
    %c0_57 = arith.constant 0 : index
    %c0_58 = arith.constant 0 : index
    %167 = vector.load %arg8[%c0_57, %c0_58] : memref<8x128xf32, #tpu.memory_space<vmem>>, vector<8x128xf32>
    %168 = arith.addf %167, %158 : vector<8x128xf32>
    %c0_59 = arith.constant 0 : index
    %c0_60 = arith.constant 0 : index
    %169 = vector.load %arg8[%c0_59, %c0_60] : memref<8x128xf32, #tpu.memory_space<vmem>>, vector<8x128xf32>
    tpu.vector_store %arg8[%c0_59, %c0_60], %168 {strides = array<i32>} : memref<8x128xf32, #tpu.memory_space<vmem>>, vector<8x128xf32>,
    %170 = arith.mulf %154, %154 : vector<8x128xf32>
    %c0_61 = arith.constant 0 : index
    %c0_62 = arith.constant 0 : index
    %171 = vector.load %arg9[%c0_61, %c0_62] : memref<8x128xf32, #tpu.memory_space<vmem>>, vector<8x128xf32>
    %172 = arith.addf %171, %170 : vector<8x128xf32>
    %c0_63 = arith.constant 0 : index
    %c0_64 = arith.constant 0 : index
    %173 = vector.load %arg9[%c0_63, %c0_64] : memref<8x128xf32, #tpu.memory_space<vmem>>, vector<8x128xf32>
    tpu.vector_store %arg9[%c0_63, %c0_64], %172 {strides = array<i32>} : memref<8x128xf32, #tpu.memory_space<vmem>>, vector<8x128xf32>,
    %c0_i32_65 = arith.constant 0 : i32
    %174 = arith.cmpi eq, %arg1, %c0_i32_65 : i32
    %175 = arith.extui %174 : i1 to i32
    %c0_i32_66 = arith.constant 0 : i32
    %176 = arith.cmpi ne, %175, %c0_i32_66 : i32
    scf.if %176 {
      %177 = tpu.iota {dimensions = array<i32: 1>} : vector<8x128xi32>
      %c0_i32_67 = arith.constant 0 : i32
      %178 = vector.broadcast %c0_i32_67 : i32 to vector<8x128xi32>
      %179 = arith.cmpi eq, %177, %178 : vector<8x128xi32>
      %c0_68 = arith.constant 0 : index
      %c0_69 = arith.constant 0 : index
      %180 = vector.load %arg6[%c0_68, %c0_69] : memref<8x128xf32, #tpu.memory_space<vmem>>, vector<8x128xf32>
      %181 = vector.shape_cast %180 : vector<8x128xf32> to vector<1x8x128xf32>
      %cst_70 = arith.constant dense<0.000000e+00> : vector<1xf32>
      %182 = vector.multi_reduction <add>, %181, %cst_70 [1, 2] : vector<1x8x128xf32> to vector<1xf32>
      %183 = vector.shape_cast %182 : vector<1xf32> to vector<1x1x1xf32>
      %184 = vector.extract %183[0, 0, 0] : f32 from vector<1x1x1xf32>
      %cst_71 = arith.constant 0.000000e+00 : f32
      %185 = vector.broadcast %184 : f32 to vector<8x128xf32>
      %186 = vector.broadcast %cst_71 : f32 to vector<8x128xf32>
      %187 = arith.select %179, %185, %186 : vector<8x128xi1>, vector<8x128xf32>
      %c1_i32 = arith.constant 1 : i32
      %188 = vector.broadcast %c1_i32 : i32 to vector<8x128xi32>
      %189 = arith.cmpi eq, %177, %188 : vector<8x128xi32>
      %c0_72 = arith.constant 0 : index
      %c0_73 = arith.constant 0 : index
      %190 = vector.load %arg7[%c0_72, %c0_73] : memref<8x128xf32, #tpu.memory_space<vmem>>, vector<8x128xf32>
      %191 = vector.shape_cast %190 : vector<8x128xf32> to vector<1x8x128xf32>
      %cst_74 = arith.constant dense<0.000000e+00> : vector<1xf32>
      %192 = vector.multi_reduction <add>, %191, %cst_74 [1, 2] : vector<1x8x128xf32> to vector<1xf32>
      %193 = vector.shape_cast %192 : vector<1xf32> to vector<1x1x1xf32>
      %194 = vector.extract %193[0, 0, 0] : f32 from vector<1x1x1xf32>
      %cst_75 = arith.constant 0.000000e+00 : f32
      %195 = vector.broadcast %194 : f32 to vector<8x128xf32>
      %196 = vector.broadcast %cst_75 : f32 to vector<8x128xf32>
      %197 = arith.select %189, %195, %196 : vector<8x128xi1>, vector<8x128xf32>
      %198 = arith.addf %187, %197 : vector<8x128xf32>
      %c2_i32 = arith.constant 2 : i32
      %199 = vector.broadcast %c2_i32 : i32 to vector<8x128xi32>
      %200 = arith.cmpi eq, %177, %199 : vector<8x128xi32>
      %c0_76 = arith.constant 0 : index
      %c0_77 = arith.constant 0 : index
      %201 = vector.load %arg8[%c0_76, %c0_77] : memref<8x128xf32, #tpu.memory_space<vmem>>, vector<8x128xf32>
      %202 = vector.shape_cast %201 : vector<8x128xf32> to vector<1x8x128xf32>
      %cst_78 = arith.constant dense<0.000000e+00> : vector<1xf32>
      %203 = vector.multi_reduction <add>, %202, %cst_78 [1, 2] : vector<1x8x128xf32> to vector<1xf32>
      %204 = vector.shape_cast %203 : vector<1xf32> to vector<1x1x1xf32>
      %205 = vector.extract %204[0, 0, 0] : f32 from vector<1x1x1xf32>
      %cst_79 = arith.constant 0.000000e+00 : f32
      %206 = vector.broadcast %205 : f32 to vector<8x128xf32>
      %207 = vector.broadcast %cst_79 : f32 to vector<8x128xf32>
      %208 = arith.select %200, %206, %207 : vector<8x128xi1>, vector<8x128xf32>
      %209 = arith.addf %198, %208 : vector<8x128xf32>
      %c3_i32 = arith.constant 3 : i32
      %210 = vector.broadcast %c3_i32 : i32 to vector<8x128xi32>
      %211 = arith.cmpi eq, %177, %210 : vector<8x128xi32>
      %c0_80 = arith.constant 0 : index
      %c0_81 = arith.constant 0 : index
      %212 = vector.load %arg9[%c0_80, %c0_81] : memref<8x128xf32, #tpu.memory_space<vmem>>, vector<8x128xf32>
      %213 = vector.shape_cast %212 : vector<8x128xf32> to vector<1x8x128xf32>
      %cst_82 = arith.constant dense<0.000000e+00> : vector<1xf32>
      %214 = vector.multi_reduction <add>, %213, %cst_82 [1, 2] : vector<1x8x128xf32> to vector<1xf32>
      %215 = vector.shape_cast %214 : vector<1xf32> to vector<1x1x1xf32>
      %216 = vector.extract %215[0, 0, 0] : f32 from vector<1x1x1xf32>
      %cst_83 = arith.constant 0.000000e+00 : f32
      %217 = vector.broadcast %216 : f32 to vector<8x128xf32>
      %218 = vector.broadcast %cst_83 : f32 to vector<8x128xf32>
      %219 = arith.select %211, %217, %218 : vector<8x128xi1>, vector<8x128xf32>
      %220 = arith.addf %209, %219 : vector<8x128xf32>
      %221 = vector.shape_cast %220 : vector<8x128xf32> to vector<1x8x128xf32>
      %c0_84 = arith.constant 0 : index
      %c0_85 = arith.constant 0 : index
      %c0_86 = arith.constant 0 : index
      %222 = vector.load %arg5[%c0_84, %c0_85, %c0_86] : memref<1x8x128xf32, #tpu.memory_space<vmem>>, vector<1x8x128xf32>
      tpu.vector_store %arg5[%c0_84, %c0_85, %c0_86], %221 {strides = array<i32>} : memref<1x8x128xf32, #tpu.memory_space<vmem>>, vector<1x8x128xf32>,
    } else {
    }
    return
  }
  func.func @transform_0(%arg0: i32, %arg1: i32) -> (i32, i32, i32) {
    %c0_i32 = arith.constant 0 : i32
    %c0_i32_0 = arith.constant 0 : i32
    return %arg0, %arg1, %c0_i32 : i32, i32, i32
  }
  func.func @transform_1(%arg0: i32, %arg1: i32) -> (i32, i32) {
    %c0_i32 = arith.constant 0 : i32
    %c0_i32_0 = arith.constant 0 : i32
    %c0_i32_1 = arith.constant 0 : i32
    return %c0_i32, %c0_i32_0 : i32, i32
  }
  func.func @transform_2(%arg0: i32, %arg1: i32) -> (i32, i32) {
    %c0_i32 = arith.constant 0 : i32
    %c0_i32_0 = arith.constant 0 : i32
    %c0_i32_1 = arith.constant 0 : i32
    return %c0_i32, %c0_i32_0 : i32, i32
  }
  func.func @transform_3(%arg0: i32, %arg1: i32) -> (i32, i32, i32) {
    %c0_i32 = arith.constant 0 : i32
    %c0_i32_0 = arith.constant 0 : i32
    %c0_i32_1 = arith.constant 0 : i32
    return %arg0, %c0_i32, %c0_i32_0 : i32, i32, i32
  }
}

module attributes {stable_mosaic.version = 11 : i64} {
  func.func @_lf4smp_kernel(%arg0: i32, %arg1: i32, %arg2: memref<1x16x32xbf16, #tpu.memory_space<vmem>>, %arg3: memref<32x256xbf16, #tpu.memory_space<vmem>>, %arg4: memref<1x128xf32, #tpu.memory_space<vmem>>, %arg5: memref<1x8x128xf32, #tpu.memory_space<vmem>>, %arg6: memref<8x128xf32, #tpu.memory_space<vmem>>, %arg7: memref<8x128xf32, #tpu.memory_space<vmem>>, %arg8: memref<8x128xf32, #tpu.memory_space<vmem>>, %arg9: memref<8x128xf32, #tpu.memory_space<vmem>>) attributes {dimension_semantics = [#tpu.dimension_semantics<parallel>, #tpu.dimension_semantics<arbitrary>], iteration_bounds = array<i64: 2, 1>, scalar_prefetch = 0 : i64, scratch_operands = 4 : i64, tpu.core_type = #tpu.core_type<tc>, window_params = [{transform_indices = @transform_0, window_bounds = array<i64: 1, 16, 32>}, {pipeline_mode = #tpu.pipeline_mode<synchronous>, transform_indices = @transform_1, window_bounds = array<i64: 32, 256>}, {pipeline_mode = #tpu.pipeline_mode<synchronous>, transform_indices = @transform_2, window_bounds = array<i64: 1, 128>}, {transform_indices = @transform_3, window_bounds = array<i64: 1, 8, 128>}]} {
    %c0_i32 = arith.constant 0 : i32
    %0 = arith.cmpi eq, %arg1, %c0_i32 : i32
    %1 = arith.extui %0 : i1 to i32
    %c0_i32_0 = arith.constant 0 : i32
    %2 = arith.cmpi ne, %1, %c0_i32_0 : i32
    scf.if %2 {
      %cst_67 = arith.constant 0.000000e+00 : f32
      %177 = vector.broadcast %cst_67 : f32 to vector<8x128xf32>
      %c0_68 = arith.constant 0 : index
      %c0_69 = arith.constant 0 : index
      %178 = vector.load %arg6[%c0_68, %c0_69] : memref<8x128xf32, #tpu.memory_space<vmem>>, vector<8x128xf32>
      tpu.vector_store %arg6[%c0_68, %c0_69], %177 {strides = array<i32>} : memref<8x128xf32, #tpu.memory_space<vmem>>, vector<8x128xf32>,
      %cst_70 = arith.constant 0.000000e+00 : f32
      %179 = vector.broadcast %cst_70 : f32 to vector<8x128xf32>
      %c0_71 = arith.constant 0 : index
      %c0_72 = arith.constant 0 : index
      %180 = vector.load %arg7[%c0_71, %c0_72] : memref<8x128xf32, #tpu.memory_space<vmem>>, vector<8x128xf32>
      tpu.vector_store %arg7[%c0_71, %c0_72], %179 {strides = array<i32>} : memref<8x128xf32, #tpu.memory_space<vmem>>, vector<8x128xf32>,
      %cst_73 = arith.constant 0.000000e+00 : f32
      %181 = vector.broadcast %cst_73 : f32 to vector<8x128xf32>
      %c0_74 = arith.constant 0 : index
      %c0_75 = arith.constant 0 : index
      %182 = vector.load %arg8[%c0_74, %c0_75] : memref<8x128xf32, #tpu.memory_space<vmem>>, vector<8x128xf32>
      tpu.vector_store %arg8[%c0_74, %c0_75], %181 {strides = array<i32>} : memref<8x128xf32, #tpu.memory_space<vmem>>, vector<8x128xf32>,
      %cst_76 = arith.constant 0.000000e+00 : f32
      %183 = vector.broadcast %cst_76 : f32 to vector<8x128xf32>
      %c0_77 = arith.constant 0 : index
      %c0_78 = arith.constant 0 : index
      %184 = vector.load %arg9[%c0_77, %c0_78] : memref<8x128xf32, #tpu.memory_space<vmem>>, vector<8x128xf32>
      tpu.vector_store %arg9[%c0_77, %c0_78], %183 {strides = array<i32>} : memref<8x128xf32, #tpu.memory_space<vmem>>, vector<8x128xf32>,
    } else {
    }
    %c0 = arith.constant 0 : index
    %c0_1 = arith.constant 0 : index
    %c0_2 = arith.constant 0 : index
    %3 = vector.load %arg2[%c0, %c0_1, %c0_2] : memref<1x16x32xbf16, #tpu.memory_space<vmem>>, vector<1x16x32xbf16>
    %4 = vector.shape_cast %3 : vector<1x16x32xbf16> to vector<16x32xbf16>
    %c0_3 = arith.constant 0 : index
    %c0_4 = arith.constant 0 : index
    %5 = vector.load %arg3[%c0_3, %c0_4] : memref<32x256xbf16, #tpu.memory_space<vmem>>, vector<32x256xbf16>
    %c0_5 = arith.constant 0 : index
    %c0_6 = arith.constant 0 : index
    %6 = vector.load %arg4[%c0_5, %c0_6] : memref<1x128xf32, #tpu.memory_space<vmem>>, vector<1x128xf32>
    %cst = arith.constant dense<0.000000e+00> : vector<16x256xf32>
    %7 = tpu.matmul %4, %5, %cst {dimension_numbers = #tpu.dot_dimension_numbers<[1], [0], [0], [1], [0, 0, 1, 1], [], []>} : vector<16x32xbf16>, vector<32x256xbf16>, vector<16x256xf32> -> vector<16x256xf32>
    %8 = vector.extract_strided_slice %7 {offsets = [0, 0], sizes = [8, 128], strides = [1, 1]} : vector<16x256xf32> to vector<8x128xf32>
    %9 = vector.extract_strided_slice %7 {offsets = [0, 128], sizes = [8, 128], strides = [1, 1]} : vector<16x256xf32> to vector<8x128xf32>
    %10 = vector.extract_strided_slice %7 {offsets = [8, 0], sizes = [8, 128], strides = [1, 1]} : vector<16x256xf32> to vector<8x128xf32>
    %11 = vector.extract_strided_slice %7 {offsets = [8, 128], sizes = [8, 128], strides = [1, 1]} : vector<16x256xf32> to vector<8x128xf32>
    %12 = arith.mulf %8, %8 : vector<8x128xf32>
    %13 = arith.mulf %9, %9 : vector<8x128xf32>
    %14 = arith.addf %12, %13 : vector<8x128xf32>
    %15 = math.sqrt %14 : vector<8x128xf32>
    %cst_7 = arith.constant 1.000000e-07 : f32
    %16 = vector.broadcast %cst_7 : f32 to vector<8x128xf32>
    %17 = arith.addf %15, %16 : vector<8x128xf32>
    %18 = arith.mulf %10, %10 : vector<8x128xf32>
    %19 = arith.mulf %11, %11 : vector<8x128xf32>
    %20 = arith.addf %18, %19 : vector<8x128xf32>
    %21 = math.sqrt %20 : vector<8x128xf32>
    %cst_8 = arith.constant 1.000000e-07 : f32
    %22 = vector.broadcast %cst_8 : f32 to vector<8x128xf32>
    %23 = arith.addf %21, %22 : vector<8x128xf32>
    %24 = math.absf %8 : vector<8x128xf32>
    %25 = math.absf %9 : vector<8x128xf32>
    %26 = arith.maximumf %24, %25 : vector<8x128xf32>
    %27 = arith.minimumf %24, %25 : vector<8x128xf32>
    %cst_9 = arith.constant 0.000000e+00 : f32
    %28 = vector.broadcast %cst_9 : f32 to vector<8x128xf32>
    %29 = arith.cmpf oeq, %26, %28 : vector<8x128xf32>
    %cst_10 = arith.constant 1.000000e+00 : f32
    %30 = vector.broadcast %cst_10 : f32 to vector<8x128xf32>
    %31 = arith.select %29, %30, %26 : vector<8x128xi1>, vector<8x128xf32>
    %32 = tpu.reciprocal %31 {approx = true} : vector<8x128xf32> -> vector<8x128xf32>
    %33 = arith.mulf %27, %32 : vector<8x128xf32>
    %34 = arith.mulf %33, %33 : vector<8x128xf32>
    %cst_11 = arith.constant 2.083510e-02 : f32
    %35 = vector.broadcast %cst_11 : f32 to vector<8x128xf32>
    %36 = arith.mulf %35, %34 : vector<8x128xf32>
    %cst_12 = arith.constant -8.513300e-02 : f32
    %37 = vector.broadcast %cst_12 : f32 to vector<8x128xf32>
    %38 = arith.addf %36, %37 : vector<8x128xf32>
    %39 = arith.mulf %38, %34 : vector<8x128xf32>
    %cst_13 = arith.constant 1.801410e-01 : f32
    %40 = vector.broadcast %cst_13 : f32 to vector<8x128xf32>
    %41 = arith.addf %39, %40 : vector<8x128xf32>
    %42 = arith.mulf %41, %34 : vector<8x128xf32>
    %cst_14 = arith.constant -0.330299497 : f32
    %43 = vector.broadcast %cst_14 : f32 to vector<8x128xf32>
    %44 = arith.addf %42, %43 : vector<8x128xf32>
    %45 = arith.mulf %44, %34 : vector<8x128xf32>
    %cst_15 = arith.constant 9.998660e-01 : f32
    %46 = vector.broadcast %cst_15 : f32 to vector<8x128xf32>
    %47 = arith.addf %45, %46 : vector<8x128xf32>
    %48 = arith.mulf %47, %33 : vector<8x128xf32>
    %49 = arith.cmpf ogt, %25, %24 : vector<8x128xf32>
    %cst_16 = arith.constant 1.57079637 : f32
    %50 = vector.broadcast %cst_16 : f32 to vector<8x128xf32>
    %51 = arith.subf %50, %48 : vector<8x128xf32>
    %52 = arith.select %49, %51, %48 : vector<8x128xi1>, vector<8x128xf32>
    %cst_17 = arith.constant 0.000000e+00 : f32
    %53 = vector.broadcast %cst_17 : f32 to vector<8x128xf32>
    %54 = arith.cmpf olt, %8, %53 : vector<8x128xf32>
    %cst_18 = arith.constant 3.14159274 : f32
    %55 = vector.broadcast %cst_18 : f32 to vector<8x128xf32>
    %56 = arith.subf %55, %52 : vector<8x128xf32>
    %57 = arith.select %54, %56, %52 : vector<8x128xi1>, vector<8x128xf32>
    %cst_19 = arith.constant 0.000000e+00 : f32
    %58 = vector.broadcast %cst_19 : f32 to vector<8x128xf32>
    %59 = arith.cmpf olt, %9, %58 : vector<8x128xf32>
    %cst_20 = arith.constant 0.000000e+00 : f32
    %60 = vector.broadcast %cst_20 : f32 to vector<8x128xf32>
    %61 = arith.subf %60, %57 : vector<8x128xf32>
    %62 = arith.select %59, %61, %57 : vector<8x128xi1>, vector<8x128xf32>
    %63 = vector.broadcast %6 : vector<1x128xf32> to vector<8x128xf32>
    %64 = arith.mulf %62, %63 : vector<8x128xf32>
    %65 = math.absf %10 : vector<8x128xf32>
    %66 = math.absf %11 : vector<8x128xf32>
    %67 = arith.maximumf %65, %66 : vector<8x128xf32>
    %68 = arith.minimumf %65, %66 : vector<8x128xf32>
    %cst_21 = arith.constant 0.000000e+00 : f32
    %69 = vector.broadcast %cst_21 : f32 to vector<8x128xf32>
    %70 = arith.cmpf oeq, %67, %69 : vector<8x128xf32>
    %cst_22 = arith.constant 1.000000e+00 : f32
    %71 = vector.broadcast %cst_22 : f32 to vector<8x128xf32>
    %72 = arith.select %70, %71, %67 : vector<8x128xi1>, vector<8x128xf32>
    %73 = tpu.reciprocal %72 {approx = true} : vector<8x128xf32> -> vector<8x128xf32>
    %74 = arith.mulf %68, %73 : vector<8x128xf32>
    %75 = arith.mulf %74, %74 : vector<8x128xf32>
    %cst_23 = arith.constant 2.083510e-02 : f32
    %76 = vector.broadcast %cst_23 : f32 to vector<8x128xf32>
    %77 = arith.mulf %76, %75 : vector<8x128xf32>
    %cst_24 = arith.constant -8.513300e-02 : f32
    %78 = vector.broadcast %cst_24 : f32 to vector<8x128xf32>
    %79 = arith.addf %77, %78 : vector<8x128xf32>
    %80 = arith.mulf %79, %75 : vector<8x128xf32>
    %cst_25 = arith.constant 1.801410e-01 : f32
    %81 = vector.broadcast %cst_25 : f32 to vector<8x128xf32>
    %82 = arith.addf %80, %81 : vector<8x128xf32>
    %83 = arith.mulf %82, %75 : vector<8x128xf32>
    %cst_26 = arith.constant -0.330299497 : f32
    %84 = vector.broadcast %cst_26 : f32 to vector<8x128xf32>
    %85 = arith.addf %83, %84 : vector<8x128xf32>
    %86 = arith.mulf %85, %75 : vector<8x128xf32>
    %cst_27 = arith.constant 9.998660e-01 : f32
    %87 = vector.broadcast %cst_27 : f32 to vector<8x128xf32>
    %88 = arith.addf %86, %87 : vector<8x128xf32>
    %89 = arith.mulf %88, %74 : vector<8x128xf32>
    %90 = arith.cmpf ogt, %66, %65 : vector<8x128xf32>
    %cst_28 = arith.constant 1.57079637 : f32
    %91 = vector.broadcast %cst_28 : f32 to vector<8x128xf32>
    %92 = arith.subf %91, %89 : vector<8x128xf32>
    %93 = arith.select %90, %92, %89 : vector<8x128xi1>, vector<8x128xf32>
    %cst_29 = arith.constant 0.000000e+00 : f32
    %94 = vector.broadcast %cst_29 : f32 to vector<8x128xf32>
    %95 = arith.cmpf olt, %10, %94 : vector<8x128xf32>
    %cst_30 = arith.constant 3.14159274 : f32
    %96 = vector.broadcast %cst_30 : f32 to vector<8x128xf32>
    %97 = arith.subf %96, %93 : vector<8x128xf32>
    %98 = arith.select %95, %97, %93 : vector<8x128xi1>, vector<8x128xf32>
    %cst_31 = arith.constant 0.000000e+00 : f32
    %99 = vector.broadcast %cst_31 : f32 to vector<8x128xf32>
    %100 = arith.cmpf olt, %11, %99 : vector<8x128xf32>
    %cst_32 = arith.constant 0.000000e+00 : f32
    %101 = vector.broadcast %cst_32 : f32 to vector<8x128xf32>
    %102 = arith.subf %101, %98 : vector<8x128xf32>
    %103 = arith.select %100, %102, %98 : vector<8x128xi1>, vector<8x128xf32>
    %104 = vector.broadcast %6 : vector<1x128xf32> to vector<8x128xf32>
    %105 = arith.mulf %103, %104 : vector<8x128xf32>
    %106 = arith.subf %17, %23 : vector<8x128xf32>
    %107 = arith.addf %17, %23 : vector<8x128xf32>
    %108 = arith.mulf %64, %64 : vector<8x128xf32>
    %cst_33 = arith.constant -1.14707454E-11 : f32
    %109 = vector.broadcast %cst_33 : f32 to vector<8x128xf32>
    %110 = arith.mulf %109, %108 : vector<8x128xf32>
    %cst_34 = arith.constant 2.08767559E-9 : f32
    %111 = vector.broadcast %cst_34 : f32 to vector<8x128xf32>
    %112 = arith.addf %110, %111 : vector<8x128xf32>
    %113 = arith.mulf %112, %108 : vector<8x128xf32>
    %cst_35 = arith.constant -2.755732E-7 : f32
    %114 = vector.broadcast %cst_35 : f32 to vector<8x128xf32>
    %115 = arith.addf %113, %114 : vector<8x128xf32>
    %116 = arith.mulf %115, %108 : vector<8x128xf32>
    %cst_36 = arith.constant 2.48015876E-5 : f32
    %117 = vector.broadcast %cst_36 : f32 to vector<8x128xf32>
    %118 = arith.addf %116, %117 : vector<8x128xf32>
    %119 = arith.mulf %118, %108 : vector<8x128xf32>
    %cst_37 = arith.constant -0.00138888892 : f32
    %120 = vector.broadcast %cst_37 : f32 to vector<8x128xf32>
    %121 = arith.addf %119, %120 : vector<8x128xf32>
    %122 = arith.mulf %121, %108 : vector<8x128xf32>
    %cst_38 = arith.constant 0.0416666679 : f32
    %123 = vector.broadcast %cst_38 : f32 to vector<8x128xf32>
    %124 = arith.addf %122, %123 : vector<8x128xf32>
    %125 = arith.mulf %124, %108 : vector<8x128xf32>
    %cst_39 = arith.constant -5.000000e-01 : f32
    %126 = vector.broadcast %cst_39 : f32 to vector<8x128xf32>
    %127 = arith.addf %125, %126 : vector<8x128xf32>
    %128 = arith.mulf %127, %108 : vector<8x128xf32>
    %cst_40 = arith.constant 1.000000e+00 : f32
    %129 = vector.broadcast %cst_40 : f32 to vector<8x128xf32>
    %130 = arith.addf %128, %129 : vector<8x128xf32>
    %131 = arith.mulf %105, %105 : vector<8x128xf32>
    %cst_41 = arith.constant -1.14707454E-11 : f32
    %132 = vector.broadcast %cst_41 : f32 to vector<8x128xf32>
    %133 = arith.mulf %132, %131 : vector<8x128xf32>
    %cst_42 = arith.constant 2.08767559E-9 : f32
    %134 = vector.broadcast %cst_42 : f32 to vector<8x128xf32>
    %135 = arith.addf %133, %134 : vector<8x128xf32>
    %136 = arith.mulf %135, %131 : vector<8x128xf32>
    %cst_43 = arith.constant -2.755732E-7 : f32
    %137 = vector.broadcast %cst_43 : f32 to vector<8x128xf32>
    %138 = arith.addf %136, %137 : vector<8x128xf32>
    %139 = arith.mulf %138, %131 : vector<8x128xf32>
    %cst_44 = arith.constant 2.48015876E-5 : f32
    %140 = vector.broadcast %cst_44 : f32 to vector<8x128xf32>
    %141 = arith.addf %139, %140 : vector<8x128xf32>
    %142 = arith.mulf %141, %131 : vector<8x128xf32>
    %cst_45 = arith.constant -0.00138888892 : f32
    %143 = vector.broadcast %cst_45 : f32 to vector<8x128xf32>
    %144 = arith.addf %142, %143 : vector<8x128xf32>
    %145 = arith.mulf %144, %131 : vector<8x128xf32>
    %cst_46 = arith.constant 0.0416666679 : f32
    %146 = vector.broadcast %cst_46 : f32 to vector<8x128xf32>
    %147 = arith.addf %145, %146 : vector<8x128xf32>
    %148 = arith.mulf %147, %131 : vector<8x128xf32>
    %cst_47 = arith.constant -5.000000e-01 : f32
    %149 = vector.broadcast %cst_47 : f32 to vector<8x128xf32>
    %150 = arith.addf %148, %149 : vector<8x128xf32>
    %151 = arith.mulf %150, %131 : vector<8x128xf32>
    %cst_48 = arith.constant 1.000000e+00 : f32
    %152 = vector.broadcast %cst_48 : f32 to vector<8x128xf32>
    %153 = arith.addf %151, %152 : vector<8x128xf32>
    %154 = arith.subf %130, %153 : vector<8x128xf32>
    %155 = math.log %17 : vector<8x128xf32>
    %156 = math.log %23 : vector<8x128xf32>
    %157 = arith.subf %155, %156 : vector<8x128xf32>
    %158 = math.absf %157 : vector<8x128xf32>
    %159 = arith.mulf %106, %106 : vector<8x128xf32>
    %c0_49 = arith.constant 0 : index
    %c0_50 = arith.constant 0 : index
    %160 = vector.load %arg6[%c0_49, %c0_50] : memref<8x128xf32, #tpu.memory_space<vmem>>, vector<8x128xf32>
    %161 = arith.addf %160, %159 : vector<8x128xf32>
    %c0_51 = arith.constant 0 : index
    %c0_52 = arith.constant 0 : index
    %162 = vector.load %arg6[%c0_51, %c0_52] : memref<8x128xf32, #tpu.memory_space<vmem>>, vector<8x128xf32>
    tpu.vector_store %arg6[%c0_51, %c0_52], %161 {strides = array<i32>} : memref<8x128xf32, #tpu.memory_space<vmem>>, vector<8x128xf32>,
    %163 = arith.mulf %107, %107 : vector<8x128xf32>
    %c0_53 = arith.constant 0 : index
    %c0_54 = arith.constant 0 : index
    %164 = vector.load %arg7[%c0_53, %c0_54] : memref<8x128xf32, #tpu.memory_space<vmem>>, vector<8x128xf32>
    %165 = arith.addf %164, %163 : vector<8x128xf32>
    %c0_55 = arith.constant 0 : index
    %c0_56 = arith.constant 0 : index
    %166 = vector.load %arg7[%c0_55, %c0_56] : memref<8x128xf32, #tpu.memory_space<vmem>>, vector<8x128xf32>
    tpu.vector_store %arg7[%c0_55, %c0_56], %165 {strides = array<i32>} : memref<8x128xf32, #tpu.memory_space<vmem>>, vector<8x128xf32>,
    %c0_57 = arith.constant 0 : index
    %c0_58 = arith.constant 0 : index
    %167 = vector.load %arg8[%c0_57, %c0_58] : memref<8x128xf32, #tpu.memory_space<vmem>>, vector<8x128xf32>
    %168 = arith.addf %167, %158 : vector<8x128xf32>
    %c0_59 = arith.constant 0 : index
    %c0_60 = arith.constant 0 : index
    %169 = vector.load %arg8[%c0_59, %c0_60] : memref<8x128xf32, #tpu.memory_space<vmem>>, vector<8x128xf32>
    tpu.vector_store %arg8[%c0_59, %c0_60], %168 {strides = array<i32>} : memref<8x128xf32, #tpu.memory_space<vmem>>, vector<8x128xf32>,
    %170 = arith.mulf %154, %154 : vector<8x128xf32>
    %c0_61 = arith.constant 0 : index
    %c0_62 = arith.constant 0 : index
    %171 = vector.load %arg9[%c0_61, %c0_62] : memref<8x128xf32, #tpu.memory_space<vmem>>, vector<8x128xf32>
    %172 = arith.addf %171, %170 : vector<8x128xf32>
    %c0_63 = arith.constant 0 : index
    %c0_64 = arith.constant 0 : index
    %173 = vector.load %arg9[%c0_63, %c0_64] : memref<8x128xf32, #tpu.memory_space<vmem>>, vector<8x128xf32>
    tpu.vector_store %arg9[%c0_63, %c0_64], %172 {strides = array<i32>} : memref<8x128xf32, #tpu.memory_space<vmem>>, vector<8x128xf32>,
    %c0_i32_65 = arith.constant 0 : i32
    %174 = arith.cmpi eq, %arg1, %c0_i32_65 : i32
    %175 = arith.extui %174 : i1 to i32
    %c0_i32_66 = arith.constant 0 : i32
    %176 = arith.cmpi ne, %175, %c0_i32_66 : i32
    scf.if %176 {
      %177 = tpu.iota {dimensions = array<i32: 1>} : vector<8x128xi32>
      %c0_i32_67 = arith.constant 0 : i32
      %178 = vector.broadcast %c0_i32_67 : i32 to vector<8x128xi32>
      %179 = arith.cmpi eq, %177, %178 : vector<8x128xi32>
      %c0_68 = arith.constant 0 : index
      %c0_69 = arith.constant 0 : index
      %180 = vector.load %arg6[%c0_68, %c0_69] : memref<8x128xf32, #tpu.memory_space<vmem>>, vector<8x128xf32>
      %181 = vector.shape_cast %180 : vector<8x128xf32> to vector<1x8x128xf32>
      %cst_70 = arith.constant dense<0.000000e+00> : vector<1xf32>
      %182 = vector.multi_reduction <add>, %181, %cst_70 [1, 2] : vector<1x8x128xf32> to vector<1xf32>
      %183 = vector.shape_cast %182 : vector<1xf32> to vector<1x1x1xf32>
      %184 = vector.extract %183[0, 0, 0] : f32 from vector<1x1x1xf32>
      %cst_71 = arith.constant 0.000000e+00 : f32
      %185 = vector.broadcast %184 : f32 to vector<8x128xf32>
      %186 = vector.broadcast %cst_71 : f32 to vector<8x128xf32>
      %187 = arith.select %179, %185, %186 : vector<8x128xi1>, vector<8x128xf32>
      %c1_i32 = arith.constant 1 : i32
      %188 = vector.broadcast %c1_i32 : i32 to vector<8x128xi32>
      %189 = arith.cmpi eq, %177, %188 : vector<8x128xi32>
      %c0_72 = arith.constant 0 : index
      %c0_73 = arith.constant 0 : index
      %190 = vector.load %arg7[%c0_72, %c0_73] : memref<8x128xf32, #tpu.memory_space<vmem>>, vector<8x128xf32>
      %191 = vector.shape_cast %190 : vector<8x128xf32> to vector<1x8x128xf32>
      %cst_74 = arith.constant dense<0.000000e+00> : vector<1xf32>
      %192 = vector.multi_reduction <add>, %191, %cst_74 [1, 2] : vector<1x8x128xf32> to vector<1xf32>
      %193 = vector.shape_cast %192 : vector<1xf32> to vector<1x1x1xf32>
      %194 = vector.extract %193[0, 0, 0] : f32 from vector<1x1x1xf32>
      %cst_75 = arith.constant 0.000000e+00 : f32
      %195 = vector.broadcast %194 : f32 to vector<8x128xf32>
      %196 = vector.broadcast %cst_75 : f32 to vector<8x128xf32>
      %197 = arith.select %189, %195, %196 : vector<8x128xi1>, vector<8x128xf32>
      %198 = arith.addf %187, %197 : vector<8x128xf32>
      %c2_i32 = arith.constant 2 : i32
      %199 = vector.broadcast %c2_i32 : i32 to vector<8x128xi32>
      %200 = arith.cmpi eq, %177, %199 : vector<8x128xi32>
      %c0_76 = arith.constant 0 : index
      %c0_77 = arith.constant 0 : index
      %201 = vector.load %arg8[%c0_76, %c0_77] : memref<8x128xf32, #tpu.memory_space<vmem>>, vector<8x128xf32>
      %202 = vector.shape_cast %201 : vector<8x128xf32> to vector<1x8x128xf32>
      %cst_78 = arith.constant dense<0.000000e+00> : vector<1xf32>
      %203 = vector.multi_reduction <add>, %202, %cst_78 [1, 2] : vector<1x8x128xf32> to vector<1xf32>
      %204 = vector.shape_cast %203 : vector<1xf32> to vector<1x1x1xf32>
      %205 = vector.extract %204[0, 0, 0] : f32 from vector<1x1x1xf32>
      %cst_79 = arith.constant 0.000000e+00 : f32
      %206 = vector.broadcast %205 : f32 to vector<8x128xf32>
      %207 = vector.broadcast %cst_79 : f32 to vector<8x128xf32>
      %208 = arith.select %200, %206, %207 : vector<8x128xi1>, vector<8x128xf32>
      %209 = arith.addf %198, %208 : vector<8x128xf32>
      %c3_i32 = arith.constant 3 : i32
      %210 = vector.broadcast %c3_i32 : i32 to vector<8x128xi32>
      %211 = arith.cmpi eq, %177, %210 : vector<8x128xi32>
      %c0_80 = arith.constant 0 : index
      %c0_81 = arith.constant 0 : index
      %212 = vector.load %arg9[%c0_80, %c0_81] : memref<8x128xf32, #tpu.memory_space<vmem>>, vector<8x128xf32>
      %213 = vector.shape_cast %212 : vector<8x128xf32> to vector<1x8x128xf32>
      %cst_82 = arith.constant dense<0.000000e+00> : vector<1xf32>
      %214 = vector.multi_reduction <add>, %213, %cst_82 [1, 2] : vector<1x8x128xf32> to vector<1xf32>
      %215 = vector.shape_cast %214 : vector<1xf32> to vector<1x1x1xf32>
      %216 = vector.extract %215[0, 0, 0] : f32 from vector<1x1x1xf32>
      %cst_83 = arith.constant 0.000000e+00 : f32
      %217 = vector.broadcast %216 : f32 to vector<8x128xf32>
      %218 = vector.broadcast %cst_83 : f32 to vector<8x128xf32>
      %219 = arith.select %211, %217, %218 : vector<8x128xi1>, vector<8x128xf32>
      %220 = arith.addf %209, %219 : vector<8x128xf32>
      %221 = vector.shape_cast %220 : vector<8x128xf32> to vector<1x8x128xf32>
      %c0_84 = arith.constant 0 : index
      %c0_85 = arith.constant 0 : index
      %c0_86 = arith.constant 0 : index
      %222 = vector.load %arg5[%c0_84, %c0_85, %c0_86] : memref<1x8x128xf32, #tpu.memory_space<vmem>>, vector<1x8x128xf32>
      tpu.vector_store %arg5[%c0_84, %c0_85, %c0_86], %221 {strides = array<i32>} : memref<1x8x128xf32, #tpu.memory_space<vmem>>, vector<1x8x128xf32>,
    } else {
    }
    return
  }
  func.func @transform_0(%arg0: i32, %arg1: i32) -> (i32, i32, i32) {
    %c0_i32 = arith.constant 0 : i32
    %c0_i32_0 = arith.constant 0 : i32
    return %arg0, %arg1, %c0_i32 : i32, i32, i32
  }
  func.func @transform_1(%arg0: i32, %arg1: i32) -> (i32, i32) {
    %c0_i32 = arith.constant 0 : i32
    %c0_i32_0 = arith.constant 0 : i32
    %c0_i32_1 = arith.constant 0 : i32
    return %c0_i32, %c0_i32_0 : i32, i32
  }
  func.func @transform_2(%arg0: i32, %arg1: i32) -> (i32, i32) {
    %c0_i32 = arith.constant 0 : i32
    %c0_i32_0 = arith.constant 0 : i32
    %c0_i32_1 = arith.constant 0 : i32
    return %c0_i32, %c0_i32_0 : i32, i32
  }
  func.func @transform_3(%arg0: i32, %arg1: i32) -> (i32, i32, i32) {
    %c0_i32 = arith.constant 0 : i32
    %c0_i32_0 = arith.constant 0 : i32
    %c0_i32_1 = arith.constant 0 : i32
    return %arg0, %c0_i32, %c0_i32_0 : i32, i32, i32
  }
}

</mosaic_0001>

<bundles_post_ra>
// kernel: dlfssmp_loss.3
= control target key start
LH: loop header
LB: loop body
LE: loop exit
PB: predicated region body
PF: predicated region fallthrough
CT: control target
= control target key end

     0   :  { %s666_s12 = smov 0   ;;  %s668_s13 = smov 0   ;;  %s771_s0 = inlined_call_operand.vmem [shape: bf16[2,16,32], index: 0, kind: input, shape index: {}]   ;;  %s772_s1 = inlined_call_operand.vmem [shape: bf16[32,256], index: 1, kind: input, shape index: {}]   ;;  %s773_s2 = inlined_call_operand.vmem [shape: f32[1,128], index: 2, kind: input, shape index: {}]   ;;  %s774_s3 = inlined_call_operand.vmem [shape: f32[2,8,128], index: 3, kind: output, shape index: {}]  }
   0x1   :  { %s670_s14 = smov 0  }
   0x2 LB: > { %s25_s15 = sadd.s32 1, %s639_s13  ;;  %p555_p0 = scmp.ge.s32.totalorder %s643_s14, 1  ;;  %s643_s14 = sphi %s670_s14, %s13_s14   ;;  %s639_s13 = sphi %s668_s13, %s776_s13   ;;  %s635_s12 = sphi %s666_s12, %s775_s12  }
   0x3   : > { %p27_p1 = scmp.ge.s32.totalorder %s25_s15, 2  ;;  %p156_p2 = scmp.lt.s32.totalorder %s643_s14, 3 }
   0x5   : > { %s778_s15 = smov (%p27_p1, %s25_s15), 0  ;;  %p157_p3 = pnand %p555_p0, %p156_p2 }
   0x6   : > { %v602_v0 = vld [vmem:[%s772_s1 + $0x4] ss:$8 sps:$4 sm:$0xff] (!%p157_p3)   ;;  %p184_p4 = scmp.lt.s32.totalorder (!%p157_p3), %s635_s12, 1  ;;  %v604_v1 = vld [vmem:[%s772_s1] ss:$8 sps:$4 sm:$0xff] (!%p157_p3)   ;;  %v645_v2 = vmov (!%p157_p3), 0  }
   0x7   : > { %160 = sbr.rel (%p157_p3) target bundleno = 527 (0x20f), region = 32  ;;  %274 = vmatprep.mubr.bf16.mxu0 (!%p157_p3), %v645_v2  ;;  %242 = vmatprep.subr.bf16.mxu0 (!%p157_p3), %v602_v0  ;;  %v605_v3 = vld [vmem:[%s772_s1 + $0x14] ss:$8 sps:$4 sm:$0xff] (!%p157_p3)   ;;  %v607_v4 = vld [vmem:[%s772_s1 + $0x10] ss:$8 sps:$4 sm:$0xff] (!%p157_p3)   ;;  %vm238_vm0 = vcmask (!%p157_p3), 261120  }
   0x8   : > { %243 = vmatpush1.bf16.msra.mxu0 (!%p157_p3), %v604_v1 }
   0x9   : > { %244 = vmatprep.subr.bf16.mxu0 (!%p157_p3), %v605_v3 }
   0xc   : > { %245 = vmatpush1.bf16.msra.mxu0 (!%p157_p3), %v607_v4 }
   0xe   : > { %s780_s12 = smov (!%p184_p4, %s635_s12), 1 }
   0xf   : > { %s568_s24 = sshll.u32 %s780_s12, 3 }
  0x10   : > { %s191_s27 = scalar_lea.vmem %s771_s0, %s568_s24  ;;  %s196_s9 = scalar_lea.vmem %s774_s3, %s568_s24 }
  0x11   : > { %v608_v5 = vld [vmem:[%s191_s27] sm:$0xff]  }
  0x12   : > { %564 = vmatmul.mubr.msk.bf16.vlgmr.msra.gmra.mrb[0].mxu0 %vm238_vm0, %v608_v5 }
  0xe5   : > { %v704_v6 = vpop.f32.mrb[0].mxu0 }
  0xe6   : > { %v285_v7 = vmul.f32 %v704_v6, %v704_v6  ;;  %v709_v8 = vand.u32 2147483647, %v704_v6  ;;  %v711_v9 = vpop.f32.mrb[1].mxu0  ;;  %vm328_vm9 = vcmp.lt.f32.partialorder %v704_v6, 0.0 }
  0xe7   : > { %v286_v10 = vmul.f32 %v711_v9, %v711_v9  ;;  %v716_v11 = vand.u32 2147483647, %v711_v9  ;;  %v718_v12 = vpop.f32.mrb[2].mxu0  ;;  %vm331_vm10 = vcmp.lt.f32.partialorder %v711_v9, 0.0 }
  0xe8   : > { %v296_v13 = vmul.f32 %v718_v12, %v718_v12  ;;  %v723_v14 = vand.u32 2147483647, %v718_v12  ;;  %v725_v15 = vpop.f32.mrb[3].mxu0  ;;  %vm362_vm11 = vcmp.lt.f32.partialorder %v718_v12, 0.0 }
  0xe9   : > { %v287_v16 = vadd.f32 %v286_v10, %v285_v7  ;;  %v309_v17 = vmax.f32 %v709_v8, %v716_v11  ;;  %v310_v18 = vmin.f32 %v709_v8, %v716_v11  ;;  %vm325_vm1 = vcmp.gt.f32.partialorder %v716_v11, %v709_v8 }
  0xea   : > { %v297_v19 = vmul.f32 %v725_v15, %v725_v15  ;;  %v736_v20 = vand.u32 2147483647, %v725_v15  ;;  %vm365_vm12 = vcmp.lt.f32.partialorder %v725_v15, 0.0 }
  0xeb   : > { %vm311_vm2 = vcmp.eq.f32.partialorder %v309_v17, 0.0  ;;  %609 = vrsqrt.f32 %v287_v16  ;;  %vm290_vm5 = vcmp.eq.f32.partialorder %v287_v16, inf  ;;  %v293_v29 = vand.u32 2147483648, %v287_v16 }
  0xec   : > { %v312_v21 = vsel %vm311_vm2, 1.0, %v309_v17  ;;  %v298_v22 = vadd.f32 %v297_v19, %v296_v13  ;;  %v343_v23 = vmax.f32 %v723_v14, %v736_v20  ;;  %v344_v24 = vmin.f32 %v723_v14, %v736_v20 }
  0xed   : > { %611 = vrcp.f32 %v312_v21  ;;  %vm359_vm3 = vcmp.gt.f32.partialorder %v736_v20, %v723_v14  ;;  %vm292_vm6 = vcmp.eq.f32.partialorder %v287_v16, 0.0 }
  0xee   : > { %613 = vrsqrt.f32 %v298_v22  ;;  %vm345_vm4 = vcmp.eq.f32.partialorder %v343_v23, 0.0  ;;  %vm301_vm7 = vcmp.eq.f32.partialorder %v298_v22, inf  ;;  %v304_v38 = vand.u32 2147483648, %v298_v22 }
  0xef   : > { %v346_v25 = vsel %vm345_vm4, 1.0, %v343_v23  ;;  %vm303_vm8 = vcmp.eq.f32.partialorder %v298_v22, 0.0  ;;  %v565_v23 = vld [vmem:[%s773_s2] ss:$0 sm:$0xff] }
  0xf0   : > { %615 = vrcp.f32 %v346_v25 }
  0xf5   : > { %v610_v26 = vpop.eup %609 }
  0xf6   : > { %v289_v27 = vmul.f32 %v610_v26, %v287_v16 }
  0xf7   : > { %v612_v28 = vpop.eup %611 }
  0xf8   : > { %v614_v30 = vpop.eup %613  ;;  %v314_v31 = vmul.f32 %v612_v28, %v310_v18  ;;  %v291_v32 = vsel %vm290_vm5, %v287_v16, %v289_v27 }
  0xf9   : > { %v294_v33 = vsel %vm292_vm6, %v293_v29, %v291_v32  ;;  %v300_v34 = vmul.f32 %v614_v30, %v298_v22 }
  0xfa   : > { %v616_v35 = vpop.eup %615  ;;  %v315_v36 = vmul.f32 %v314_v31, %v314_v31  ;;  %v295_v37 = vadd.f32 1e-07, %v294_v33 }
  0xfb   : > { %v348_v39 = vmul.f32 %v616_v35, %v344_v24  ;;  %v302_v40 = vsel %vm301_vm7, %v298_v22, %v300_v34 }
  0xfc   : > { %v316_v41 = vmul.f32 0.0208351, %v315_v36  ;;  %v305_v42 = vsel %vm303_vm8, %v304_v38, %v302_v40  ;;  %617 = vlog2.f32 %v295_v37 }
  0xfd   : > { %v349_v43 = vmul.f32 %v348_v39, %v348_v39  ;;  %v306_v44 = vadd.f32 1e-07, %v305_v42 }
  0xfe   : > { %v317_v45 = vadd.f32 -0.085133, %v316_v41 }
  0xff   : > { %v350_v46 = vmul.f32 0.0208351, %v349_v43  ;;  %v369_v47 = vsub.f32 %v295_v37, %v306_v44  ;;  %v370_v48 = vadd.f32 %v306_v44, %v295_v37  ;;  %619 = vlog2.f32 %v306_v44 }
 0x100   : > { %v318_v49 = vmul.f32 %v317_v45, %v315_v36 }
 0x101   : > { %v351_v50 = vadd.f32 -0.085133, %v350_v46  ;;  %v408_v51 = vmul.f32 %v369_v47, %v369_v47  ;;  %v412_v56 = vmul.f32 %v370_v48, %v370_v48 }
 0x102   : > { %v319_v52 = vadd.f32 0.180141, %v318_v49 }
 0x103   : > { %v352_v53 = vmul.f32 %v351_v50, %v349_v43  ;;  %430 = vadd.xlane.f32.xlu0 %v408_v51 }
 0x104   : > { %v320_v54 = vmul.f32 %v319_v52, %v315_v36 }
 0x105   : > { %v353_v55 = vadd.f32 0.180141, %v352_v53 }
 0x106   : > { %v321_v57 = vadd.f32 -0.3302995, %v320_v54  ;;  %v618_v58 = vpop.eup %617 }
 0x107   : > { %v354_v59 = vmul.f32 %v353_v55, %v349_v43  ;;  %443 = vadd.xlane.f32.xlu0 %v412_v56  ;;  %v403_v0 = vmul.f32 0.6931472, %v618_v58 }
 0x108   : > { %v322_v60 = vmul.f32 %v321_v57, %v315_v36 }
 0x109   : > { %v620_v61 = vpop.eup %619  ;;  %v355_v62 = vadd.f32 -0.3302995, %v354_v59 }
 0x10a   : > { %v323_v63 = vadd.f32 0.999866, %v322_v60  ;;  %v405_v1 = vmul.f32 0.6931472, %v620_v61 }
 0x10b   : > { %v356_v2 = vmul.f32 %v355_v62, %v349_v43 }
 0x10c   : > { %v324_v3 = vmul.f32 %v323_v63, %v314_v31  ;;  %v406_v4 = vsub.f32 %v403_v0, %v405_v1 }
 0x10d   : > { %v357_v5 = vadd.f32 0.999866, %v356_v2 }
 0x10e   : > { %v326_v7 = vsub.f32 1.5707964, %v324_v3  ;;  %v407_v10 = vand.u32 2147483647, %v406_v4 }
 0x10f   : > { %v358_v13 = vmul.f32 %v357_v5, %v348_v39 }
 0x110   : > { %v327_v16 = vsel %vm325_vm1, %v326_v7, %v324_v3  ;;  %457 = vadd.xlane.f32.xlu1 %v407_v10 }
 0x111   : > { %v329_v17 = vsub.f32 3.1415927, %v327_v16  ;;  %v360_v18 = vsub.f32 1.5707964, %v358_v13 }
 0x113   : > { %v330_v19 = vsel %vm328_vm9, %v329_v17, %v327_v16  ;;  %v361_v21 = vsel %vm359_vm3, %v360_v18, %v358_v13 }
 0x114   : > { %v332_v22 = vsub.f32 0.0, %v330_v19  ;;  %v363_v24 = vsub.f32 3.1415927, %v361_v21 }
 0x116   : > { %v333_v8 = vsel %vm331_vm10, %v332_v22, %v330_v19  ;;  %v364_v11 = vsel %vm362_vm11, %v363_v24, %v361_v21 }
 0x117   : > { %v340_v25 = vmul.f32 %v565_v23, %v333_v8  ;;  %v366_v26 = vsub.f32 0.0, %v364_v11 }
 0x119   : > { %v367_v6 = vsel %vm365_vm12, %v366_v26, %v364_v11  ;;  %v371_v27 = vmul.f32 %v340_v25, %v340_v25  ;;  %v426_v25 = vlaneseq }
 0x11a   : > { %v368_v14 = vmul.f32 %v565_v23, %v367_v6 }
 0x11b   : > { %v372_v20 = vmul.f32 -1.1470745e-11, %v371_v27  ;;  %v427_v26 = vand.u32 127, %v426_v25 }
 0x11c   : > { %v386_v28 = vmul.f32 %v368_v14, %v368_v14 }
 0x11d   : > { %v373_v29 = vadd.f32 2.0876756e-09, %v372_v20  ;;  %vm441_vm13 = vcmp.eq.s32.totalorder %v427_v26, 1  ;;  %vm428_vm14 = vcmp.eq.s32.totalorder %v427_v26, 0  ;;  %vm455_vm15 = vcmp.eq.s32.totalorder %v427_v26, 2 }
 0x11e   : > { %v387_v30 = vmul.f32 -1.1470745e-11, %v386_v28  ;;  %vm469_vm0 = vcmp.eq.s32.totalorder %v427_v26, 3 }
 0x11f   : > { %v374_v31 = vmul.f32 %v373_v29, %v371_v27 }
 0x120   : > { %v388_v32 = vadd.f32 2.0876756e-09, %v387_v30 }
 0x121   : > { %v375_v33 = vadd.f32 -2.755732e-07, %v374_v31 }
 0x122   : > { %v389_v34 = vmul.f32 %v388_v32, %v386_v28 }
 0x123   : > { %v376_v9 = vmul.f32 %v375_v33, %v371_v27 }
 0x124   : > { %v390_v35 = vadd.f32 -2.755732e-07, %v389_v34 }
 0x125   : > { %v377_v12 = vadd.f32 2.4801588e-05, %v376_v9 }
 0x126   : > { %v391_v36 = vmul.f32 %v390_v35, %v386_v28 }
 0x127   : > { %v378_v37 = vmul.f32 %v377_v12, %v371_v27 }
 0x128   : > { %v392_v38 = vadd.f32 2.4801588e-05, %v391_v36 }
 0x129   : > { %v379_v39 = vadd.f32 -0.0013888889, %v378_v37 }
 0x12a   : > { %v393_v40 = vmul.f32 %v392_v38, %v386_v28 }
 0x12b   : > { %v380_v15 = vmul.f32 %v379_v39, %v371_v27 }
 0x12c   : > { %v394_v41 = vadd.f32 -0.0013888889, %v393_v40 }
 0x12d   : > { %v381_v42 = vadd.f32 0.041666668, %v380_v15 }
 0x12e   : > { %v395_v43 = vmul.f32 %v394_v41, %v386_v28 }
 0x12f   : > { %v382_v44 = vmul.f32 %v381_v42, %v371_v27 }
 0x130   : > { %v396_v45 = vadd.f32 0.041666668, %v395_v43 }
 0x131   : > { %v383_v46 = vadd.f32 -0.5, %v382_v44 }
 0x132   : > { %v397_v47 = vmul.f32 %v396_v45, %v386_v28 }
 0x133   : > { %v384_v48 = vmul.f32 %v383_v46, %v371_v27 }
 0x134   : > { %v398_v49 = vadd.f32 -0.5, %v397_v47 }
 0x135   : > { %v385_v51 = vadd.f32 1.0, %v384_v48 }
 0x136   : > { %v399_v50 = vmul.f32 %v398_v49, %v386_v28 }
 0x138   : > { %v400_v52 = vadd.f32 1.0, %v399_v50 }
 0x13a   : > { %v401_v53 = vsub.f32 %v385_v51, %v400_v52 }
 0x13c   : > { %v419_v54 = vmul.f32 %v401_v53, %v401_v53 }
 0x13e   : > { %471 = vadd.xlane.f32.xlu1 %v419_v54 }
 0x190   : > { %v431_v55 = vpop.xlane.xlu0 %430 }
 0x191   : > { %v432_v56 = vrot.slane %v431_v55, 4 }
 0x193   : > { %v433_v57 = vadd.f32 %v432_v56, %v431_v55 }
 0x194   : > { %v444_v58 = vpop.xlane.xlu0 %443 }
 0x195   : > { %v434_v59 = vrot.slane %v433_v57, 2  ;;  %v445_v60 = vrot.slane %v444_v58, 4 }
 0x197   : > { %v446_v61 = vadd.f32 %v445_v60, %v444_v58  ;;  %v435_v62 = vadd.f32 %v434_v59, %v433_v57 }
 0x199   : > { %v447_v63 = vrot.slane %v446_v61, 2  ;;  %v436_v0 = vrot.slane %v435_v62, 1 }
 0x19b   : > { %v448_v1 = vadd.f32 %v447_v63, %v446_v61  ;;  %v437_v2 = vadd.f32 %v436_v0, %v435_v62 }
 0x19d   : > { %v458_v3 = vpop.xlane.xlu1 %457  ;;  %569 = vpush %v437_v2  ;;  %v449_v4 = vrot.slane %v448_v1, 1 }
 0x19e   : > { %v459_v5 = vrot.slane %v458_v3, 4 }
 0x19f   : > { %v450_v7 = vadd.f32 %v449_v4, %v448_v1 }
 0x1a0   : > { %v460_v10 = vadd.f32 %v459_v5, %v458_v3 }
 0x1a1   : > { %571 = vpush %v450_v7 }
 0x1a2   : > { %v461_v13 = vrot.slane %v460_v10, 2 }
 0x1a4   : > { %v462_v16 = vadd.f32 %v461_v13, %v460_v10 }
 0x1a6   : > { %v463_v17 = vrot.slane %v462_v16, 1 }
 0x1a8   : > { %v464_v18 = vadd.f32 %v463_v17, %v462_v16 }
 0x1aa   : > { %573 = vpush %v464_v18 }
 0x1cb   : > { %v472_v19 = vpop.xlane.xlu1 %471 }
 0x1cc   : > { %v473_v21 = vrot.slane %v472_v19, 4 }
 0x1ce   : > { %v474_v22 = vadd.f32 %v473_v21, %v472_v19  ;;  %s570_s30 = spop %569 }
 0x1cf   : > { %v439_v27 = vstv %s570_s30 }
 0x1d0   : > { %v475_v23 = vrot.slane %v474_v22, 2  ;;  %v440_v28 = vsel %vm428_vm14, %v439_v27, 0.0 }
 0x1d2   : > { %v476_v24 = vadd.f32 %v475_v23, %v474_v22  ;;  %s572_s4 = spop %571 }
 0x1d3   : > { %v452_v6 = vstv %s572_s4 }
 0x1d4   : > { %v477_v8 = vrot.slane %v476_v24, 1  ;;  %v453_v20 = vsel %vm441_vm13, %v452_v6, 0.0 }
 0x1d5   : > { %v454_v30 = vadd.f32 %v453_v20, %v440_v28 }
 0x1d6   : > { %v478_v11 = vadd.f32 %v477_v8, %v476_v24 }
 0x1d8   : > { %575 = vpush %v478_v11 }
 0x1db   : > { %s574_s5 = spop %573 }
 0x1dc   : > { %v466_v14 = vstv %s574_s5 }
 0x1dd   : > { %v467_v29 = vsel %vm455_vm15, %v466_v14, 0.0 }
 0x1de   : > { %v468_v31 = vadd.f32 %v467_v29, %v454_v30 }
 0x209   : > { %s576_s6 = spop %575 }
 0x20a   : > { %v480_v32 = vstv %s576_s6 }
 0x20b   : > { %v481_v33 = vsel %vm469_vm0, %v480_v32, 0.0 }
 0x20c   : > { %v482_v34 = vadd.f32 %v481_v33, %v468_v31 }
 0x20e   : > { %483 = vst [vmem:[%s196_s9] sm:$0xff] %v482_v34 }
 0x20f PF: > { %s13_s14 = sadd.s32 1, %s643_s14   ;;  %s775_s12 = smov %s639_s13 }
 0x210   : > { %p10_p5 = scmp.ge.s32.totalorder %s13_s14, 4   ;;  %s776_s13 = smov %s778_s15 }
 0x212   :  { %12 = sbr.rel (!%p10_p5) target bundleno = 2 (0x2), region = 70 }

// kernel: dlfssmp_loss.2
= control target key start
LH: loop header
LB: loop body
LE: loop exit
PB: predicated region body
PF: predicated region fallthrough
CT: control target
= control target key end

     0   :  { %s649_s12 = smov 0   ;;  %s651_s13 = smov 0   ;;  %s748_s0 = inlined_call_operand.vmem [shape: bf16[2,16,16], index: 0, kind: input, shape index: {}]   ;;  %s749_s1 = inlined_call_operand.vmem [shape: bf16[16,256], index: 1, kind: input, shape index: {}]   ;;  %s750_s2 = inlined_call_operand.vmem [shape: f32[1,128], index: 2, kind: input, shape index: {}]   ;;  %s751_s3 = inlined_call_operand.vmem [shape: f32[2,8,128], index: 3, kind: output, shape index: {}]  }
   0x1   :  { %s653_s14 = smov 0  }
   0x2 LB: > { %s25_s15 = sadd.s32 1, %s622_s13  ;;  %p543_p0 = scmp.ge.s32.totalorder %s626_s14, 1  ;;  %s626_s14 = sphi %s653_s14, %s13_s14   ;;  %s622_s13 = sphi %s651_s13, %s753_s13   ;;  %s618_s12 = sphi %s649_s12, %s752_s12  }
   0x3   : > { %p27_p1 = scmp.ge.s32.totalorder %s25_s15, 2  ;;  %p156_p2 = scmp.lt.s32.totalorder %s626_s14, 3 }
   0x5   : > { %s755_s15 = smov (%p27_p1, %s25_s15), 0  ;;  %p157_p3 = pnand %p543_p0, %p156_p2 }
   0x6   : > { %v588_v0 = vld [vmem:[%s749_s1 + $0x4] ss:$8 sps:$4 sm:$0xff] (!%p157_p3)   ;;  %p184_p4 = scmp.lt.s32.totalorder (!%p157_p3), %s618_s12, 1  ;;  %v590_v1 = vld [vmem:[%s749_s1] ss:$8 sps:$4 sm:$0xff] (!%p157_p3)   ;;  %v628_v2 = vmov (!%p157_p3), 0  }
   0x7   : > { %160 = sbr.rel (%p157_p3) target bundleno = 527 (0x20f), region = 32  ;;  %262 = vmatprep.mubr.bf16.mxu0 (!%p157_p3), %v628_v2  ;;  %230 = vmatprep.subr.bf16.mxu0 (!%p157_p3), %v588_v0  ;;  %vm226_vm0 = vcmask (!%p157_p3), 130048  }
   0x8   : > { %231 = vmatpush1.bf16.msra.mxu0 (!%p157_p3), %v590_v1 }
   0xe   : > { %s757_s12 = smov (!%p184_p4, %s618_s12), 1 }
   0xf   : > { %s554_s20 = sshll.u32 %s757_s12, 3 }
  0x10   : > { %s191_s23 = scalar_lea.vmem %s748_s0, %s554_s20  ;;  %s196_s5 = scalar_lea.vmem %s751_s3, %s554_s20 }
  0x11   : > { %v591_v3 = vld [vmem:[%s191_s23] sm:$0xff]  }
  0x12   : > { %550 = vmatmul.mubr.msk.bf16.vlgmr.msra.gmra.mrb[0].mxu0 %vm226_vm0, %v591_v3 }
  0xe5   : > { %v681_v4 = vpop.f32.mrb[0].mxu0 }
  0xe6   : > { %v273_v5 = vmul.f32 %v681_v4, %v681_v4  ;;  %v686_v6 = vand.u32 2147483647, %v681_v4  ;;  %v688_v7 = vpop.f32.mrb[1].mxu0  ;;  %vm316_vm9 = vcmp.lt.f32.partialorder %v681_v4, 0.0 }
  0xe7   : > { %v274_v8 = vmul.f32 %v688_v7, %v688_v7  ;;  %v693_v9 = vand.u32 2147483647, %v688_v7  ;;  %v695_v10 = vpop.f32.mrb[2].mxu0  ;;  %vm319_vm10 = vcmp.lt.f32.partialorder %v688_v7, 0.0 }
  0xe8   : > { %v284_v11 = vmul.f32 %v695_v10, %v695_v10  ;;  %v700_v12 = vand.u32 2147483647, %v695_v10  ;;  %v702_v13 = vpop.f32.mrb[3].mxu0  ;;  %vm350_vm11 = vcmp.lt.f32.partialorder %v695_v10, 0.0 }
  0xe9   : > { %v275_v14 = vadd.f32 %v274_v8, %v273_v5  ;;  %v297_v15 = vmax.f32 %v686_v6, %v693_v9  ;;  %v298_v16 = vmin.f32 %v686_v6, %v693_v9  ;;  %vm313_vm1 = vcmp.gt.f32.partialorder %v693_v9, %v686_v6 }
  0xea   : > { %v285_v17 = vmul.f32 %v702_v13, %v702_v13  ;;  %v713_v18 = vand.u32 2147483647, %v702_v13  ;;  %vm353_vm12 = vcmp.lt.f32.partialorder %v702_v13, 0.0 }
  0xeb   : > { %vm299_vm2 = vcmp.eq.f32.partialorder %v297_v15, 0.0  ;;  %592 = vrsqrt.f32 %v275_v14  ;;  %vm278_vm5 = vcmp.eq.f32.partialorder %v275_v14, inf  ;;  %v281_v27 = vand.u32 2147483648, %v275_v14 }
  0xec   : > { %v300_v19 = vsel %vm299_vm2, 1.0, %v297_v15  ;;  %v286_v20 = vadd.f32 %v285_v17, %v284_v11  ;;  %v331_v21 = vmax.f32 %v700_v12, %v713_v18  ;;  %v332_v22 = vmin.f32 %v700_v12, %v713_v18 }
  0xed   : > { %594 = vrcp.f32 %v300_v19  ;;  %vm347_vm3 = vcmp.gt.f32.partialorder %v713_v18, %v700_v12  ;;  %vm280_vm6 = vcmp.eq.f32.partialorder %v275_v14, 0.0 }
  0xee   : > { %596 = vrsqrt.f32 %v286_v20  ;;  %vm333_vm4 = vcmp.eq.f32.partialorder %v331_v21, 0.0  ;;  %vm289_vm7 = vcmp.eq.f32.partialorder %v286_v20, inf  ;;  %v292_v36 = vand.u32 2147483648, %v286_v20 }
  0xef   : > { %v334_v23 = vsel %vm333_vm4, 1.0, %v331_v21  ;;  %vm291_vm8 = vcmp.eq.f32.partialorder %v286_v20, 0.0  ;;  %v551_v21 = vld [vmem:[%s750_s2] ss:$0 sm:$0xff] }
  0xf0   : > { %598 = vrcp.f32 %v334_v23 }
  0xf5   : > { %v593_v24 = vpop.eup %592 }
  0xf6   : > { %v277_v25 = vmul.f32 %v593_v24, %v275_v14 }
  0xf7   : > { %v595_v26 = vpop.eup %594 }
  0xf8   : > { %v597_v28 = vpop.eup %596  ;;  %v302_v29 = vmul.f32 %v595_v26, %v298_v16  ;;  %v279_v30 = vsel %vm278_vm5, %v275_v14, %v277_v25 }
  0xf9   : > { %v282_v31 = vsel %vm280_vm6, %v281_v27, %v279_v30  ;;  %v288_v32 = vmul.f32 %v597_v28, %v286_v20 }
  0xfa   : > { %v599_v33 = vpop.eup %598  ;;  %v303_v34 = vmul.f32 %v302_v29, %v302_v29  ;;  %v283_v35 = vadd.f32 1e-07, %v282_v31 }
  0xfb   : > { %v336_v37 = vmul.f32 %v599_v33, %v332_v22  ;;  %v290_v38 = vsel %vm289_vm7, %v286_v20, %v288_v32 }
  0xfc   : > { %v304_v39 = vmul.f32 0.0208351, %v303_v34  ;;  %v293_v40 = vsel %vm291_vm8, %v292_v36, %v290_v38  ;;  %600 = vlog2.f32 %v283_v35 }
  0xfd   : > { %v337_v41 = vmul.f32 %v336_v37, %v336_v37  ;;  %v294_v42 = vadd.f32 1e-07, %v293_v40 }
  0xfe   : > { %v305_v43 = vadd.f32 -0.085133, %v304_v39 }
  0xff   : > { %v338_v44 = vmul.f32 0.0208351, %v337_v41  ;;  %v357_v45 = vsub.f32 %v283_v35, %v294_v42  ;;  %v358_v46 = vadd.f32 %v294_v42, %v283_v35  ;;  %602 = vlog2.f32 %v294_v42 }
 0x100   : > { %v306_v47 = vmul.f32 %v305_v43, %v303_v34 }
 0x101   : > { %v339_v48 = vadd.f32 -0.085133, %v338_v44  ;;  %v396_v49 = vmul.f32 %v357_v45, %v357_v45  ;;  %v400_v54 = vmul.f32 %v358_v46, %v358_v46 }
 0x102   : > { %v307_v50 = vadd.f32 0.180141, %v306_v47 }
 0x103   : > { %v340_v51 = vmul.f32 %v339_v48, %v337_v41  ;;  %418 = vadd.xlane.f32.xlu0 %v396_v49 }
 0x104   : > { %v308_v52 = vmul.f32 %v307_v50, %v303_v34 }
 0x105   : > { %v341_v53 = vadd.f32 0.180141, %v340_v51 }
 0x106   : > { %v309_v55 = vadd.f32 -0.3302995, %v308_v52  ;;  %v601_v56 = vpop.eup %600 }
 0x107   : > { %v342_v57 = vmul.f32 %v341_v53, %v337_v41  ;;  %431 = vadd.xlane.f32.xlu0 %v400_v54  ;;  %v391_v62 = vmul.f32 0.6931472, %v601_v56 }
 0x108   : > { %v310_v58 = vmul.f32 %v309_v55, %v303_v34 }
 0x109   : > { %v603_v59 = vpop.eup %602  ;;  %v343_v60 = vadd.f32 -0.3302995, %v342_v57 }
 0x10a   : > { %v311_v61 = vadd.f32 0.999866, %v310_v58  ;;  %v393_v63 = vmul.f32 0.6931472, %v603_v59 }
 0x10b   : > { %v344_v0 = vmul.f32 %v343_v60, %v337_v41 }
 0x10c   : > { %v312_v1 = vmul.f32 %v311_v61, %v302_v29  ;;  %v394_v2 = vsub.f32 %v391_v62, %v393_v63 }
 0x10d   : > { %v345_v3 = vadd.f32 0.999866, %v344_v0 }
 0x10e   : > { %v314_v5 = vsub.f32 1.5707964, %v312_v1  ;;  %v395_v8 = vand.u32 2147483647, %v394_v2 }
 0x10f   : > { %v346_v11 = vmul.f32 %v345_v3, %v336_v37 }
 0x110   : > { %v315_v14 = vsel %vm313_vm1, %v314_v5, %v312_v1  ;;  %445 = vadd.xlane.f32.xlu1 %v395_v8 }
 0x111   : > { %v317_v15 = vsub.f32 3.1415927, %v315_v14  ;;  %v348_v16 = vsub.f32 1.5707964, %v346_v11 }
 0x113   : > { %v318_v17 = vsel %vm316_vm9, %v317_v15, %v315_v14  ;;  %v349_v19 = vsel %vm347_vm3, %v348_v16, %v346_v11 }
 0x114   : > { %v320_v20 = vsub.f32 0.0, %v318_v17  ;;  %v351_v22 = vsub.f32 3.1415927, %v349_v19 }
 0x116   : > { %v321_v6 = vsel %vm319_vm10, %v320_v20, %v318_v17  ;;  %v352_v9 = vsel %vm350_vm11, %v351_v22, %v349_v19 }
 0x117   : > { %v328_v23 = vmul.f32 %v551_v21, %v321_v6  ;;  %v354_v24 = vsub.f32 0.0, %v352_v9 }
 0x119   : > { %v355_v4 = vsel %vm353_vm12, %v354_v24, %v352_v9  ;;  %v359_v25 = vmul.f32 %v328_v23, %v328_v23  ;;  %v414_v23 = vlaneseq }
 0x11a   : > { %v356_v12 = vmul.f32 %v551_v21, %v355_v4 }
 0x11b   : > { %v360_v18 = vmul.f32 -1.1470745e-11, %v359_v25  ;;  %v415_v24 = vand.u32 127, %v414_v23 }
 0x11c   : > { %v374_v26 = vmul.f32 %v356_v12, %v356_v12 }
 0x11d   : > { %v361_v27 = vadd.f32 2.0876756e-09, %v360_v18  ;;  %vm429_vm13 = vcmp.eq.s32.totalorder %v415_v24, 1  ;;  %vm416_vm14 = vcmp.eq.s32.totalorder %v415_v24, 0  ;;  %vm443_vm15 = vcmp.eq.s32.totalorder %v415_v24, 2 }
 0x11e   : > { %v375_v28 = vmul.f32 -1.1470745e-11, %v374_v26  ;;  %vm457_vm0 = vcmp.eq.s32.totalorder %v415_v24, 3 }
 0x11f   : > { %v362_v29 = vmul.f32 %v361_v27, %v359_v25 }
 0x120   : > { %v376_v30 = vadd.f32 2.0876756e-09, %v375_v28 }
 0x121   : > { %v363_v31 = vadd.f32 -2.755732e-07, %v362_v29 }
 0x122   : > { %v377_v32 = vmul.f32 %v376_v30, %v374_v26 }
 0x123   : > { %v364_v7 = vmul.f32 %v363_v31, %v359_v25 }
 0x124   : > { %v378_v33 = vadd.f32 -2.755732e-07, %v377_v32 }
 0x125   : > { %v365_v10 = vadd.f32 2.4801588e-05, %v364_v7 }
 0x126   : > { %v379_v34 = vmul.f32 %v378_v33, %v374_v26 }
 0x127   : > { %v366_v35 = vmul.f32 %v365_v10, %v359_v25 }
 0x128   : > { %v380_v36 = vadd.f32 2.4801588e-05, %v379_v34 }
 0x129   : > { %v367_v37 = vadd.f32 -0.0013888889, %v366_v35 }
 0x12a   : > { %v381_v38 = vmul.f32 %v380_v36, %v374_v26 }
 0x12b   : > { %v368_v13 = vmul.f32 %v367_v37, %v359_v25 }
 0x12c   : > { %v382_v39 = vadd.f32 -0.0013888889, %v381_v38 }
 0x12d   : > { %v369_v40 = vadd.f32 0.041666668, %v368_v13 }
 0x12e   : > { %v383_v41 = vmul.f32 %v382_v39, %v374_v26 }
 0x12f   : > { %v370_v42 = vmul.f32 %v369_v40, %v359_v25 }
 0x130   : > { %v384_v43 = vadd.f32 0.041666668, %v383_v41 }
 0x131   : > { %v371_v44 = vadd.f32 -0.5, %v370_v42 }
 0x132   : > { %v385_v45 = vmul.f32 %v384_v43, %v374_v26 }
 0x133   : > { %v372_v46 = vmul.f32 %v371_v44, %v359_v25 }
 0x134   : > { %v386_v47 = vadd.f32 -0.5, %v385_v45 }
 0x135   : > { %v373_v49 = vadd.f32 1.0, %v372_v46 }
 0x136   : > { %v387_v48 = vmul.f32 %v386_v47, %v374_v26 }
 0x138   : > { %v388_v50 = vadd.f32 1.0, %v387_v48 }
 0x13a   : > { %v389_v51 = vsub.f32 %v373_v49, %v388_v50 }
 0x13c   : > { %v407_v52 = vmul.f32 %v389_v51, %v389_v51 }
 0x13e   : > { %459 = vadd.xlane.f32.xlu1 %v407_v52 }
 0x190   : > { %v419_v53 = vpop.xlane.xlu0 %418 }
 0x191   : > { %v420_v54 = vrot.slane %v419_v53, 4 }
 0x193   : > { %v421_v55 = vadd.f32 %v420_v54, %v419_v53 }
 0x194   : > { %v432_v56 = vpop.xlane.xlu0 %431 }
 0x195   : > { %v422_v57 = vrot.slane %v421_v55, 2  ;;  %v433_v58 = vrot.slane %v432_v56, 4 }
 0x197   : > { %v434_v59 = vadd.f32 %v433_v58, %v432_v56  ;;  %v423_v60 = vadd.f32 %v422_v57, %v421_v55 }
 0x199   : > { %v435_v61 = vrot.slane %v434_v59, 2  ;;  %v424_v62 = vrot.slane %v423_v60, 1 }
 0x19b   : > { %v436_v63 = vadd.f32 %v435_v61, %v434_v59  ;;  %v425_v0 = vadd.f32 %v424_v62, %v423_v60 }
 0x19d   : > { %v446_v1 = vpop.xlane.xlu1 %445  ;;  %555 = vpush %v425_v0  ;;  %v437_v2 = vrot.slane %v436_v63, 1 }
 0x19e   : > { %v447_v3 = vrot.slane %v446_v1, 4 }
 0x19f   : > { %v438_v5 = vadd.f32 %v437_v2, %v436_v63 }
 0x1a0   : > { %v448_v8 = vadd.f32 %v447_v3, %v446_v1 }
 0x1a1   : > { %557 = vpush %v438_v5 }
 0x1a2   : > { %v449_v11 = vrot.slane %v448_v8, 2 }
 0x1a4   : > { %v450_v14 = vadd.f32 %v449_v11, %v448_v8 }
 0x1a6   : > { %v451_v15 = vrot.slane %v450_v14, 1 }
 0x1a8   : > { %v452_v16 = vadd.f32 %v451_v15, %v450_v14 }
 0x1aa   : > { %559 = vpush %v452_v16 }
 0x1cb   : > { %v460_v17 = vpop.xlane.xlu1 %459 }
 0x1cc   : > { %v461_v19 = vrot.slane %v460_v17, 4 }
 0x1ce   : > { %v462_v20 = vadd.f32 %v461_v19, %v460_v17  ;;  %s556_s26 = spop %555 }
 0x1cf   : > { %v427_v25 = vstv %s556_s26 }
 0x1d0   : > { %v463_v21 = vrot.slane %v462_v20, 2  ;;  %v428_v26 = vsel %vm416_vm14, %v427_v25, 0.0 }
 0x1d2   : > { %v464_v22 = vadd.f32 %v463_v21, %v462_v20  ;;  %s558_s27 = spop %557 }
 0x1d3   : > { %v440_v4 = vstv %s558_s27 }
 0x1d4   : > { %v465_v6 = vrot.slane %v464_v22, 1  ;;  %v441_v18 = vsel %vm429_vm13, %v440_v4, 0.0 }
 0x1d5   : > { %v442_v28 = vadd.f32 %v441_v18, %v428_v26 }
 0x1d6   : > { %v466_v9 = vadd.f32 %v465_v6, %v464_v22 }
 0x1d8   : > { %561 = vpush %v466_v9 }
 0x1db   : > { %s560_s28 = spop %559 }
 0x1dc   : > { %v454_v12 = vstv %s560_s28 }
 0x1dd   : > { %v455_v27 = vsel %vm443_vm15, %v454_v12, 0.0 }
 0x1de   : > { %v456_v29 = vadd.f32 %v455_v27, %v442_v28 }
 0x209   : > { %s562_s29 = spop %561 }
 0x20a   : > { %v468_v30 = vstv %s562_s29 }
 0x20b   : > { %v469_v31 = vsel %vm457_vm0, %v468_v30, 0.0 }
 0x20c   : > { %v470_v32 = vadd.f32 %v469_v31, %v456_v29 }
 0x20e   : > { %471 = vst [vmem:[%s196_s5] sm:$0xff] %v470_v32 }
 0x20f PF: > { %s13_s14 = sadd.s32 1, %s626_s14   ;;  %s752_s12 = smov %s622_s13 }
 0x210   : > { %p10_p5 = scmp.ge.s32.totalorder %s13_s14, 4   ;;  %s753_s13 = smov %s755_s15 }
 0x212   :  { %12 = sbr.rel (!%p10_p5) target bundleno = 2 (0x2), region = 70 }

</bundles_post_ra>
